<compile_context>
chip_gen: v5e
topology: v5e:2x2
jax: 0.10.0
libtpu: 0.0.40
codegen_flags: <defaults>
</compile_context>

<pallas_src>
import jax
import jax.numpy as jnp
from jax.experimental import pallas as pl
from jax.experimental.pallas import tpu as pltpu

# ----------------------------- config ---------------------------------------
VOCAB_SIZE = 50
VOCAB_PAD = 128   # vocab rows padded to the 128-lane one-hot width
NUM_CLASS = 4
EMB_DIM = 32
HIDDEN = 32
SEQ_LEN = 8
BATCH = 8
CPAD = 128        # lane-dense output padding for the class dimension


# ----------------------------- Pallas kernel --------------------------------
def rnn_kernel(tokf_ref, tokr_ref, wproj_ref, bias_ref, whh_ref, wfc_ref,
               bfc_ref, out_ref, xw_ref):
    """Embedding gather + fused bidirectional LSTM + final Linear, all in VMEM.

    tokf_ref : (T*B, 1) int32  forward  time-major token ids (row t*B+b = tok[b,t])
    tokr_ref : (T*B, 1) int32  reversed time-major token ids (row t*B+b = tok[b,T-1-t])
    wproj_ref: (2*VP, 8H) f32  [emb @ W_ih_fwd ; emb @ W_ih_bwd], vocab rows
                               zero-padded to VP=128; gate cols [i|f|o|g],
                               each 2H block = [fwd|bwd]
    bias_ref : (1, 8H)   f32   b_ih + b_hh, both directions, same column layout
    whh_ref  : (2H, 8H)  bf16  block-diagonal recurrent weight, rows [h_f; h_r]
    wfc_ref  : (2H, CPAD) f32  fc weight (classes lane-padded with zeros)
    bfc_ref  : (1, CPAD) f32   fc bias (lane-padded)
    out_ref  : (B, CPAD) f32
    xw_ref   : (T*B, 8H) f32   VMEM scratch: pre-combined per-step gate inputs
    """
    TB = tokf_ref.shape[0]
    B = out_ref.shape[0]
    T = TB // B
    H2 = whh_ref.shape[0]              # 2H (both directions packed)
    VP = wproj_ref.shape[0] // 2       # padded vocab (= 128)

    # ---- Embedding lookup + input projection + bias for every timestep and
    # both directions as ONE MXU op (off the serial chain): the gather is a
    # one-hot matmul against the precomputed emb @ W_ih tables.  Row t*B+b
    # already combines fwd step t with bwd step T-1-t.
    lane_iota = jax.lax.broadcasted_iota(jnp.int32, (TB, VP), 1)
    oh_f = (tokf_ref[...] == lane_iota).astype(jnp.float32)       # (TB, VP)
    oh_r = (tokr_ref[...] == lane_iota).astype(jnp.float32)       # (TB, VP)
    oh = jnp.concatenate([oh_f, oh_r], axis=1)                    # (TB, 2*VP)
    # Stage the slab in VMEM scratch so the unrolled loop reloads one step at
    # a time (vld slot) instead of pinning 16 vregs across the unroll.
    xw_ref[...] = jnp.dot(oh, wproj_ref[...],
                          preferred_element_type=jnp.float32) + bias_ref[...]

    whh = whh_ref[...]                                            # (2H, 8H) bf16

    # Gate columns are [i | f | o | g] (each 2H = [fwd|bwd]) so both
    # transcendental regions are 128-lane aligned: one full-width sigmoid on
    # lanes [0:128], and full-width sigmoid + tanh on lanes [128:256].
    def lstm_update(gates, c_prev, first):
        if_s = jax.nn.sigmoid(gates[:, :2 * H2])                  # [i | f]
        og = gates[:, 2 * H2:]                                    # [o | g] pre-act
        o_s = jax.nn.sigmoid(og)                                  # use first half
        g_t = jnp.tanh(og)                                        # use second half
        i_g = if_s[:, :H2]
        o_g = o_s[:, :H2]
        g_g = g_t[:, H2:]
        if first:                      # h = c = 0 at t == 0
            c_new = i_g * g_g
        else:
            c_new = if_s[:, H2:] * c_prev + i_g * g_g
        h_new = o_g * jnp.tanh(c_new)
        return h_new, c_new

    # ---- t = 0: initial state is zero -> skip the recurrent matmul entirely.
    h, c = lstm_update(xw_ref[0:B, :], None, first=True)

    # ---- t = 1 .. T-1: fused bidirectional recurrence, fully unrolled; one
    # (B,2H)@(2H,8H) bf16 MXU op per step is the serial backbone.
    for t in range(1, T):
        gates = (jnp.dot(h.astype(jnp.bfloat16), whh,
                         preferred_element_type=jnp.float32)
                 + xw_ref[t * B:(t + 1) * B, :])
        h, c = lstm_update(gates, c, first=False)

    # h is already [h_fwd | h_bwd] == torch.cat((h_n[0], h_n[1]), dim=1).
    out_ref[...] = (jnp.dot(h, wfc_ref[...],
                            preferred_element_type=jnp.float32)
                    + bfc_ref[...])


# ----------------------------- weight packing (one-time) ---------------------
def _reorder_ifog(w):
    """PyTorch gate order [i,f,g,o] -> [i,f,o,g] along axis 0."""
    H = HIDDEN
    return jnp.concatenate([w[0:H], w[H:2 * H], w[3 * H:4 * H], w[2 * H:3 * H]],
                           axis=0)


def _place(w4t, direction):
    """(rows, 4H) gate-major -> (rows, 8H): each gate's 2H block = [fwd|bwd]."""
    rows = w4t.shape[0]
    w = w4t.reshape(rows, 4, HIDDEN)
    z = jnp.zeros_like(w)
    parts = (w, z) if direction == 0 else (z, w)
    return jnp.concatenate(parts, axis=2).reshape(rows, 8 * HIDDEN)


def pack_params(params):
    """One-time parameter packing.  NOT part of the per-call hot path."""
    H = HIDDEN
    emb = params["embedding"].astype(jnp.float32)                  # (V, E)
    wihf = _place(_reorder_ifog(params["w_ih_f"]).T, 0)            # (E, 8H)
    wihr = _place(_reorder_ifog(params["w_ih_r"]).T, 1)            # (E, 8H)
    hp = jax.lax.Precision.HIGHEST
    proj_f = jnp.dot(emb, wihf, precision=hp)                      # (V, 8H)
    proj_r = jnp.dot(emb, wihr, precision=hp)                      # (V, 8H)
    pad = ((0, VOCAB_PAD - VOCAB_SIZE), (0, 0))
    wproj = jnp.concatenate([jnp.pad(proj_f, pad), jnp.pad(proj_r, pad)],
                            axis=0)                                # (2*VP, 8H)

    b_f = _reorder_ifog(params["b_ih_f"] + params["b_hh_f"])       # (4H,)
    b_r = _reorder_ifog(params["b_ih_r"] + params["b_hh_r"])
    bias = jnp.concatenate([b_f.reshape(4, H), b_r.reshape(4, H)],
                           axis=1).reshape(1, 8 * H)               # (1, 8H)

    whh = jnp.concatenate(
        [_place(_reorder_ifog(params["w_hh_f"]).T, 0),
         _place(_reorder_ifog(params["w_hh_r"]).T, 1)],
        axis=0).astype(jnp.bfloat16)                               # (2H, 8H)

    wfc = jnp.zeros((2 * H, CPAD), jnp.float32).at[:, :NUM_CLASS].set(
        params["fc_w"].T)
    bfc = jnp.zeros((1, CPAD), jnp.float32).at[:, :NUM_CLASS].set(
        params["fc_b"])

    return {"wproj": wproj, "bias": bias, "whh": whh, "wfc": wfc, "bfc": bfc}


# ----------------------------- hot-path wrapper -------------------------------
@jax.jit
def rnn_forward(tokens, packed):
    """tokens: (B, T) int32 token ids -> logits (B, NUM_CLASS)."""
    B, T = tokens.shape
    # Only tiny int32 token plumbing + the pallas_call live in the hot path.
    tok_f = tokens.T.reshape(T * B, 1).astype(jnp.int32)           # fwd time-major
    tok_r = tokens[:, ::-1].T.reshape(T * B, 1).astype(jnp.int32)  # reversed

    vmem = pl.BlockSpec(memory_space=pltpu.MemorySpace.VMEM)
    out = pl.pallas_call(
        rnn_kernel,
        out_shape=jax.ShapeDtypeStruct((B, CPAD), jnp.float32),
        in_specs=[vmem] * 7,
        out_specs=vmem,
        scratch_shapes=[pltpu.VMEM((T * B, 8 * HIDDEN), jnp.float32)],
    )(tok_f, tok_r, packed["wproj"], packed["bias"], packed["whh"],
      packed["wfc"], packed["bfc"])
    return out[:, :NUM_CLASS]


# ----------------------------- pure-JAX reference ----------------------------
def _lstm_dir_ref(x, w_ih, w_hh, b_ih, b_hh):
    B, T, _ = x.shape
    H = w_hh.shape[1]
    h = jnp.zeros((B, H), jnp.float32)
    c = jnp.zeros((B, H), jnp.float32)
    for t in range(T):
        gates = x[:, t, :] @ w_ih.T + b_ih + h @ w_hh.T + b_hh
        i, f, g, o = jnp.split(gates, 4, axis=1)
        c = jax.nn.sigmoid(f) * c + jax.nn.sigmoid(i) * jnp.tanh(g)
        h = jax.nn.sigmoid(o) * jnp.tanh(c)
    return h


def rnn_forward_ref(tokens, params):
    x = params["embedding"][tokens].astype(jnp.float32)
    h_f = _lstm_dir_ref(x, params["w_ih_f"], params["w_hh_f"],
                        params["b_ih_f"], params["b_hh_f"])
    h_b = _lstm_dir_ref(jnp.flip(x, axis=1), params["w_ih_r"],
                        params["w_hh_r"], params["b_ih_r"], params["b_hh_r"])
    h = jnp.concatenate([h_f, h_b], axis=1)
    return h @ params["fc_w"].T + params["fc_b"]


# ----------------------------- params / main ---------------------------------
def init_params(key):
    ks = jax.random.split(key, 12)
    k = 1.0 / jnp.sqrt(HIDDEN)
    u = lambda kk, shape: jax.random.uniform(kk, shape, jnp.float32, -k, k)
    return {
        "embedding": jax.random.normal(ks[0], (VOCAB_SIZE, EMB_DIM),
                                       jnp.float32),
        # forward direction (PyTorch gate order [i, f, g, o])
        "w_ih_f": u(ks[1], (4 * HIDDEN, EMB_DIM)),
        "w_hh_f": u(ks[2], (4 * HIDDEN, HIDDEN)),
        "b_ih_f": u(ks[3], (4 * HIDDEN,)),
        "b_hh_f": u(ks[4], (4 * HIDDEN,)),
        # backward direction
        "w_ih_r": u(ks[5], (4 * HIDDEN, EMB_DIM)),
        "w_hh_r": u(ks[6], (4 * HIDDEN, HIDDEN)),
        "b_ih_r": u(ks[7], (4 * HIDDEN,)),
        "b_hh_r": u(ks[8], (4 * HIDDEN,)),
        # fc: Linear(2H -> num_class)
        "fc_w": u(ks[9], (NUM_CLASS, 2 * HIDDEN)),
        "fc_b": u(ks[10], (NUM_CLASS,)),
    }


if __name__ == "__main__":
    key = jax.random.PRNGKey(0)
    pkey, tkey = jax.random.split(key)
    params = init_params(pkey)
    packed = pack_params(params)       # one-time packing, outside the hot path
    tokens = jax.random.randint(tkey, (BATCH, SEQ_LEN), 0, VOCAB_SIZE,
                                dtype=jnp.int32)

    logits = rnn_forward(tokens, packed)
    logits = jax.block_until_ready(logits)

    ref = rnn_forward_ref(tokens, params)
    assert logits.shape == (BATCH, NUM_CLASS)
    # Tolerance relaxed because the serial recurrent matmul uses bf16 operands
    # (f32 accumulation).
    assert jnp.allclose(logits, ref, rtol=2e-2, atol=2e-2), (
        "mismatch vs reference")

    print("KERNEL_OK")
</pallas_src>

<mosaic_0001>
module attributes {stable_mosaic.version = 11 : i64} {
  func.func @rnn_kernel(%arg0: memref<64x1xi32, #tpu.memory_space<vmem>>, %arg1: memref<64x1xi32, #tpu.memory_space<vmem>>, %arg2: memref<256x256xf32, #tpu.memory_space<vmem>>, %arg3: memref<1x256xf32, #tpu.memory_space<vmem>>, %arg4: memref<64x256xbf16, #tpu.memory_space<vmem>>, %arg5: memref<64x128xf32, #tpu.memory_space<vmem>>, %arg6: memref<1x128xf32, #tpu.memory_space<vmem>>, %arg7: memref<8x128xf32, #tpu.memory_space<vmem>>, %arg8: memref<64x256xf32, #tpu.memory_space<vmem>>) attributes {dimension_semantics = [], scalar_prefetch = 0 : i64, scratch_operands = 1 : i64, tpu.core_type = #tpu.core_type<tc>} {
    %0 = tpu.iota {dimensions = array<i32: 1>} : vector<64x128xi32>
    %c0 = arith.constant 0 : index
    %c0_0 = arith.constant 0 : index
    %1 = vector.load %arg0[%c0, %c0_0] : memref<64x1xi32, #tpu.memory_space<vmem>>, vector<64x1xi32>
    %2 = vector.broadcast %1 : vector<64x1xi32> to vector<64x128xi32>
    %3 = arith.cmpi eq, %2, %0 : vector<64x128xi32>
    %4 = arith.extui %3 : vector<64x128xi1> to vector<64x128xi32>
    %5 = arith.sitofp %4 : vector<64x128xi32> to vector<64x128xf32>
    %c0_1 = arith.constant 0 : index
    %c0_2 = arith.constant 0 : index
    %6 = vector.load %arg1[%c0_1, %c0_2] : memref<64x1xi32, #tpu.memory_space<vmem>>, vector<64x1xi32>
    %7 = vector.broadcast %6 : vector<64x1xi32> to vector<64x128xi32>
    %8 = arith.cmpi eq, %7, %0 : vector<64x128xi32>
    %9 = arith.extui %8 : vector<64x128xi1> to vector<64x128xi32>
    %10 = arith.sitofp %9 : vector<64x128xi32> to vector<64x128xf32>
    %11 = tpu.concatenate %5, %10 in 1 : vector<64x128xf32>, vector<64x128xf32> -> vector<64x256xf32>
    %c0_3 = arith.constant 0 : index
    %c0_4 = arith.constant 0 : index
    %12 = vector.load %arg2[%c0_3, %c0_4] : memref<256x256xf32, #tpu.memory_space<vmem>>, vector<256x256xf32>
    %cst = arith.constant dense<0.000000e+00> : vector<64x256xf32>
    %13 = tpu.matmul %11, %12, %cst {dimension_numbers = #tpu.dot_dimension_numbers<[1], [0], [0], [1], [0, 0, 1, 1], [], []>} : vector<64x256xf32>, vector<256x256xf32>, vector<64x256xf32> -> vector<64x256xf32>
    %c0_5 = arith.constant 0 : index
    %c0_6 = arith.constant 0 : index
    %14 = vector.load %arg3[%c0_5, %c0_6] : memref<1x256xf32, #tpu.memory_space<vmem>>, vector<1x256xf32>
    %15 = vector.broadcast %14 : vector<1x256xf32> to vector<64x256xf32>
    %16 = arith.addf %13, %15 : vector<64x256xf32>
    %c0_7 = arith.constant 0 : index
    %c0_8 = arith.constant 0 : index
    %17 = vector.load %arg8[%c0_7, %c0_8] : memref<64x256xf32, #tpu.memory_space<vmem>>, vector<64x256xf32>
    tpu.vector_store %arg8[%c0_7, %c0_8], %16 {strides = array<i32>} : memref<64x256xf32, #tpu.memory_space<vmem>>, vector<64x256xf32>,
    %c0_9 = arith.constant 0 : index
    %c0_10 = arith.constant 0 : index
    %18 = vector.load %arg4[%c0_9, %c0_10] : memref<64x256xbf16, #tpu.memory_space<vmem>>, vector<64x256xbf16>
    %c0_11 = arith.constant 0 : index
    %c0_12 = arith.constant 0 : index
    %19 = vector.load %arg8[%c0_11, %c0_12] : memref<64x256xf32, #tpu.memory_space<vmem>>, vector<8x256xf32>
    %20 = vector.extract_strided_slice %19 {offsets = [0, 0], sizes = [8, 128], strides = [1, 1]} : vector<8x256xf32> to vector<8x128xf32>
    %21 = arith.negf %20 : vector<8x128xf32>
    %22 = math.exp %21 : vector<8x128xf32>
    %cst_13 = arith.constant 1.000000e+00 : f32
    %23 = vector.broadcast %cst_13 : f32 to vector<8x128xf32>
    %24 = arith.addf %23, %22 : vector<8x128xf32>
    %25 = arith.divf %23, %24 : vector<8x128xf32>
    %26 = vector.extract_strided_slice %19 {offsets = [0, 128], sizes = [8, 128], strides = [1, 1]} : vector<8x256xf32> to vector<8x128xf32>
    %27 = arith.negf %26 : vector<8x128xf32>
    %28 = math.exp %27 : vector<8x128xf32>
    %cst_14 = arith.constant 1.000000e+00 : f32
    %29 = vector.broadcast %cst_14 : f32 to vector<8x128xf32>
    %30 = arith.addf %29, %28 : vector<8x128xf32>
    %31 = arith.divf %29, %30 : vector<8x128xf32>
    %32 = math.tanh %26 : vector<8x128xf32>
    %33 = vector.extract_strided_slice %25 {offsets = [0, 0], sizes = [8, 64], strides = [1, 1]} : vector<8x128xf32> to vector<8x64xf32>
    %34 = vector.extract_strided_slice %31 {offsets = [0, 0], sizes = [8, 64], strides = [1, 1]} : vector<8x128xf32> to vector<8x64xf32>
    %35 = vector.extract_strided_slice %32 {offsets = [0, 64], sizes = [8, 64], strides = [1, 1]} : vector<8x128xf32> to vector<8x64xf32>
    %36 = arith.mulf %33, %35 : vector<8x64xf32>
    %37 = math.tanh %36 : vector<8x64xf32>
    %38 = arith.mulf %34, %37 : vector<8x64xf32>
    %39 = arith.truncf %38 : vector<8x64xf32> to vector<8x64xbf16>
    %cst_15 = arith.constant dense<0.000000e+00> : vector<8x256xf32>
    %40 = tpu.matmul %39, %18, %cst_15 {dimension_numbers = #tpu.dot_dimension_numbers<[1], [0], [0], [1], [0, 0, 1, 1], [], []>} : vector<8x64xbf16>, vector<64x256xbf16>, vector<8x256xf32> -> vector<8x256xf32>
    %c8 = arith.constant 8 : index
    %c0_16 = arith.constant 0 : index
    %41 = vector.load %arg8[%c8, %c0_16] : memref<64x256xf32, #tpu.memory_space<vmem>>, vector<8x256xf32>
    %42 = arith.addf %40, %41 : vector<8x256xf32>
    %43 = vector.extract_strided_slice %42 {offsets = [0, 0], sizes = [8, 128], strides = [1, 1]} : vector<8x256xf32> to vector<8x128xf32>
    %44 = arith.negf %43 : vector<8x128xf32>
    %45 = math.exp %44 : vector<8x128xf32>
    %cst_17 = arith.constant 1.000000e+00 : f32
    %46 = vector.broadcast %cst_17 : f32 to vector<8x128xf32>
    %47 = arith.addf %46, %45 : vector<8x128xf32>
    %48 = arith.divf %46, %47 : vector<8x128xf32>
    %49 = vector.extract_strided_slice %42 {offsets = [0, 128], sizes = [8, 128], strides = [1, 1]} : vector<8x256xf32> to vector<8x128xf32>
    %50 = arith.negf %49 : vector<8x128xf32>
    %51 = math.exp %50 : vector<8x128xf32>
    %cst_18 = arith.constant 1.000000e+00 : f32
    %52 = vector.broadcast %cst_18 : f32 to vector<8x128xf32>
    %53 = arith.addf %52, %51 : vector<8x128xf32>
    %54 = arith.divf %52, %53 : vector<8x128xf32>
    %55 = math.tanh %49 : vector<8x128xf32>
    %56 = vector.extract_strided_slice %48 {offsets = [0, 0], sizes = [8, 64], strides = [1, 1]} : vector<8x128xf32> to vector<8x64xf32>
    %57 = vector.extract_strided_slice %54 {offsets = [0, 0], sizes = [8, 64], strides = [1, 1]} : vector<8x128xf32> to vector<8x64xf32>
    %58 = vector.extract_strided_slice %55 {offsets = [0, 64], sizes = [8, 64], strides = [1, 1]} : vector<8x128xf32> to vector<8x64xf32>
    %59 = vector.extract_strided_slice %48 {offsets = [0, 64], sizes = [8, 64], strides = [1, 1]} : vector<8x128xf32> to vector<8x64xf32>
    %60 = arith.mulf %59, %36 : vector<8x64xf32>
    %61 = arith.mulf %56, %58 : vector<8x64xf32>
    %62 = arith.addf %60, %61 : vector<8x64xf32>
    %63 = math.tanh %62 : vector<8x64xf32>
    %64 = arith.mulf %57, %63 : vector<8x64xf32>
    %65 = arith.truncf %64 : vector<8x64xf32> to vector<8x64xbf16>
    %cst_19 = arith.constant dense<0.000000e+00> : vector<8x256xf32>
    %66 = tpu.matmul %65, %18, %cst_19 {dimension_numbers = #tpu.dot_dimension_numbers<[1], [0], [0], [1], [0, 0, 1, 1], [], []>} : vector<8x64xbf16>, vector<64x256xbf16>, vector<8x256xf32> -> vector<8x256xf32>
    %c16 = arith.constant 16 : index
    %c0_20 = arith.constant 0 : index
    %67 = vector.load %arg8[%c16, %c0_20] : memref<64x256xf32, #tpu.memory_space<vmem>>, vector<8x256xf32>
    %68 = arith.addf %66, %67 : vector<8x256xf32>
    %69 = vector.extract_strided_slice %68 {offsets = [0, 0], sizes = [8, 128], strides = [1, 1]} : vector<8x256xf32> to vector<8x128xf32>
    %70 = arith.negf %69 : vector<8x128xf32>
    %71 = math.exp %70 : vector<8x128xf32>
    %cst_21 = arith.constant 1.000000e+00 : f32
    %72 = vector.broadcast %cst_21 : f32 to vector<8x128xf32>
    %73 = arith.addf %72, %71 : vector<8x128xf32>
    %74 = arith.divf %72, %73 : vector<8x128xf32>
    %75 = vector.extract_strided_slice %68 {offsets = [0, 128], sizes = [8, 128], strides = [1, 1]} : vector<8x256xf32> to vector<8x128xf32>
    %76 = arith.negf %75 : vector<8x128xf32>
    %77 = math.exp %76 : vector<8x128xf32>
    %cst_22 = arith.constant 1.000000e+00 : f32
    %78 = vector.broadcast %cst_22 : f32 to vector<8x128xf32>
    %79 = arith.addf %78, %77 : vector<8x128xf32>
    %80 = arith.divf %78, %79 : vector<8x128xf32>
    %81 = math.tanh %75 : vector<8x128xf32>
    %82 = vector.extract_strided_slice %74 {offsets = [0, 0], sizes = [8, 64], strides = [1, 1]} : vector<8x128xf32> to vector<8x64xf32>
    %83 = vector.extract_strided_slice %80 {offsets = [0, 0], sizes = [8, 64], strides = [1, 1]} : vector<8x128xf32> to vector<8x64xf32>
    %84 = vector.extract_strided_slice %81 {offsets = [0, 64], sizes = [8, 64], strides = [1, 1]} : vector<8x128xf32> to vector<8x64xf32>
    %85 = vector.extract_strided_slice %74 {offsets = [0, 64], sizes = [8, 64], strides = [1, 1]} : vector<8x128xf32> to vector<8x64xf32>
    %86 = arith.mulf %85, %62 : vector<8x64xf32>
    %87 = arith.mulf %82, %84 : vector<8x64xf32>
    %88 = arith.addf %86, %87 : vector<8x64xf32>
    %89 = math.tanh %88 : vector<8x64xf32>
    %90 = arith.mulf %83, %89 : vector<8x64xf32>
    %91 = arith.truncf %90 : vector<8x64xf32> to vector<8x64xbf16>
    %cst_23 = arith.constant dense<0.000000e+00> : vector<8x256xf32>
    %92 = tpu.matmul %91, %18, %cst_23 {dimension_numbers = #tpu.dot_dimension_numbers<[1], [0], [0], [1], [0, 0, 1, 1], [], []>} : vector<8x64xbf16>, vector<64x256xbf16>, vector<8x256xf32> -> vector<8x256xf32>
    %c24 = arith.constant 24 : index
    %c0_24 = arith.constant 0 : index
    %93 = vector.load %arg8[%c24, %c0_24] : memref<64x256xf32, #tpu.memory_space<vmem>>, vector<8x256xf32>
    %94 = arith.addf %92, %93 : vector<8x256xf32>
    %95 = vector.extract_strided_slice %94 {offsets = [0, 0], sizes = [8, 128], strides = [1, 1]} : vector<8x256xf32> to vector<8x128xf32>
    %96 = arith.negf %95 : vector<8x128xf32>
    %97 = math.exp %96 : vector<8x128xf32>
    %cst_25 = arith.constant 1.000000e+00 : f32
    %98 = vector.broadcast %cst_25 : f32 to vector<8x128xf32>
    %99 = arith.addf %98, %97 : vector<8x128xf32>
    %100 = arith.divf %98, %99 : vector<8x128xf32>
    %101 = vector.extract_strided_slice %94 {offsets = [0, 128], sizes = [8, 128], strides = [1, 1]} : vector<8x256xf32> to vector<8x128xf32>
    %102 = arith.negf %101 : vector<8x128xf32>
    %103 = math.exp %102 : vector<8x128xf32>
    %cst_26 = arith.constant 1.000000e+00 : f32
    %104 = vector.broadcast %cst_26 : f32 to vector<8x128xf32>
    %105 = arith.addf %104, %103 : vector<8x128xf32>
    %106 = arith.divf %104, %105 : vector<8x128xf32>
    %107 = math.tanh %101 : vector<8x128xf32>
    %108 = vector.extract_strided_slice %100 {offsets = [0, 0], sizes = [8, 64], strides = [1, 1]} : vector<8x128xf32> to vector<8x64xf32>
    %109 = vector.extract_strided_slice %106 {offsets = [0, 0], sizes = [8, 64], strides = [1, 1]} : vector<8x128xf32> to vector<8x64xf32>
    %110 = vector.extract_strided_slice %107 {offsets = [0, 64], sizes = [8, 64], strides = [1, 1]} : vector<8x128xf32> to vector<8x64xf32>
    %111 = vector.extract_strided_slice %100 {offsets = [0, 64], sizes = [8, 64], strides = [1, 1]} : vector<8x128xf32> to vector<8x64xf32>
    %112 = arith.mulf %111, %88 : vector<8x64xf32>
    %113 = arith.mulf %108, %110 : vector<8x64xf32>
    %114 = arith.addf %112, %113 : vector<8x64xf32>
    %115 = math.tanh %114 : vector<8x64xf32>
    %116 = arith.mulf %109, %115 : vector<8x64xf32>
    %117 = arith.truncf %116 : vector<8x64xf32> to vector<8x64xbf16>
    %cst_27 = arith.constant dense<0.000000e+00> : vector<8x256xf32>
    %118 = tpu.matmul %117, %18, %cst_27 {dimension_numbers = #tpu.dot_dimension_numbers<[1], [0], [0], [1], [0, 0, 1, 1], [], []>} : vector<8x64xbf16>, vector<64x256xbf16>, vector<8x256xf32> -> vector<8x256xf32>
    %c32 = arith.constant 32 : index
    %c0_28 = arith.constant 0 : index
    %119 = vector.load %arg8[%c32, %c0_28] : memref<64x256xf32, #tpu.memory_space<vmem>>, vector<8x256xf32>
    %120 = arith.addf %118, %119 : vector<8x256xf32>
    %121 = vector.extract_strided_slice %120 {offsets = [0, 0], sizes = [8, 128], strides = [1, 1]} : vector<8x256xf32> to vector<8x128xf32>
    %122 = arith.negf %121 : vector<8x128xf32>
    %123 = math.exp %122 : vector<8x128xf32>
    %cst_29 = arith.constant 1.000000e+00 : f32
    %124 = vector.broadcast %cst_29 : f32 to vector<8x128xf32>
    %125 = arith.addf %124, %123 : vector<8x128xf32>
    %126 = arith.divf %124, %125 : vector<8x128xf32>
    %127 = vector.extract_strided_slice %120 {offsets = [0, 128], sizes = [8, 128], strides = [1, 1]} : vector<8x256xf32> to vector<8x128xf32>
    %128 = arith.negf %127 : vector<8x128xf32>
    %129 = math.exp %128 : vector<8x128xf32>
    %cst_30 = arith.constant 1.000000e+00 : f32
    %130 = vector.broadcast %cst_30 : f32 to vector<8x128xf32>
    %131 = arith.addf %130, %129 : vector<8x128xf32>
    %132 = arith.divf %130, %131 : vector<8x128xf32>
    %133 = math.tanh %127 : vector<8x128xf32>
    %134 = vector.extract_strided_slice %126 {offsets = [0, 0], sizes = [8, 64], strides = [1, 1]} : vector<8x128xf32> to vector<8x64xf32>
    %135 = vector.extract_strided_slice %132 {offsets = [0, 0], sizes = [8, 64], strides = [1, 1]} : vector<8x128xf32> to vector<8x64xf32>
    %136 = vector.extract_strided_slice %133 {offsets = [0, 64], sizes = [8, 64], strides = [1, 1]} : vector<8x128xf32> to vector<8x64xf32>
    %137 = vector.extract_strided_slice %126 {offsets = [0, 64], sizes = [8, 64], strides = [1, 1]} : vector<8x128xf32> to vector<8x64xf32>
    %138 = arith.mulf %137, %114 : vector<8x64xf32>
    %139 = arith.mulf %134, %136 : vector<8x64xf32>
    %140 = arith.addf %138, %139 : vector<8x64xf32>
    %141 = math.tanh %140 : vector<8x64xf32>
    %142 = arith.mulf %135, %141 : vector<8x64xf32>
    %143 = arith.truncf %142 : vector<8x64xf32> to vector<8x64xbf16>
    %cst_31 = arith.constant dense<0.000000e+00> : vector<8x256xf32>
    %144 = tpu.matmul %143, %18, %cst_31 {dimension_numbers = #tpu.dot_dimension_numbers<[1], [0], [0], [1], [0, 0, 1, 1], [], []>} : vector<8x64xbf16>, vector<64x256xbf16>, vector<8x256xf32> -> vector<8x256xf32>
    %c40 = arith.constant 40 : index
    %c0_32 = arith.constant 0 : index
    %145 = vector.load %arg8[%c40, %c0_32] : memref<64x256xf32, #tpu.memory_space<vmem>>, vector<8x256xf32>
    %146 = arith.addf %144, %145 : vector<8x256xf32>
    %147 = vector.extract_strided_slice %146 {offsets = [0, 0], sizes = [8, 128], strides = [1, 1]} : vector<8x256xf32> to vector<8x128xf32>
    %148 = arith.negf %147 : vector<8x128xf32>
    %149 = math.exp %148 : vector<8x128xf32>
    %cst_33 = arith.constant 1.000000e+00 : f32
    %150 = vector.broadcast %cst_33 : f32 to vector<8x128xf32>
    %151 = arith.addf %150, %149 : vector<8x128xf32>
    %152 = arith.divf %150, %151 : vector<8x128xf32>
    %153 = vector.extract_strided_slice %146 {offsets = [0, 128], sizes = [8, 128], strides = [1, 1]} : vector<8x256xf32> to vector<8x128xf32>
    %154 = arith.negf %153 : vector<8x128xf32>
    %155 = math.exp %154 : vector<8x128xf32>
    %cst_34 = arith.constant 1.000000e+00 : f32
    %156 = vector.broadcast %cst_34 : f32 to vector<8x128xf32>
    %157 = arith.addf %156, %155 : vector<8x128xf32>
    %158 = arith.divf %156, %157 : vector<8x128xf32>
    %159 = math.tanh %153 : vector<8x128xf32>
    %160 = vector.extract_strided_slice %152 {offsets = [0, 0], sizes = [8, 64], strides = [1, 1]} : vector<8x128xf32> to vector<8x64xf32>
    %161 = vector.extract_strided_slice %158 {offsets = [0, 0], sizes = [8, 64], strides = [1, 1]} : vector<8x128xf32> to vector<8x64xf32>
    %162 = vector.extract_strided_slice %159 {offsets = [0, 64], sizes = [8, 64], strides = [1, 1]} : vector<8x128xf32> to vector<8x64xf32>
    %163 = vector.extract_strided_slice %152 {offsets = [0, 64], sizes = [8, 64], strides = [1, 1]} : vector<8x128xf32> to vector<8x64xf32>
    %164 = arith.mulf %163, %140 : vector<8x64xf32>
    %165 = arith.mulf %160, %162 : vector<8x64xf32>
    %166 = arith.addf %164, %165 : vector<8x64xf32>
    %167 = math.tanh %166 : vector<8x64xf32>
    %168 = arith.mulf %161, %167 : vector<8x64xf32>
    %169 = arith.truncf %168 : vector<8x64xf32> to vector<8x64xbf16>
    %cst_35 = arith.constant dense<0.000000e+00> : vector<8x256xf32>
    %170 = tpu.matmul %169, %18, %cst_35 {dimension_numbers = #tpu.dot_dimension_numbers<[1], [0], [0], [1], [0, 0, 1, 1], [], []>} : vector<8x64xbf16>, vector<64x256xbf16>, vector<8x256xf32> -> vector<8x256xf32>
    %c48 = arith.constant 48 : index
    %c0_36 = arith.constant 0 : index
    %171 = vector.load %arg8[%c48, %c0_36] : memref<64x256xf32, #tpu.memory_space<vmem>>, vector<8x256xf32>
    %172 = arith.addf %170, %171 : vector<8x256xf32>
    %173 = vector.extract_strided_slice %172 {offsets = [0, 0], sizes = [8, 128], strides = [1, 1]} : vector<8x256xf32> to vector<8x128xf32>
    %174 = arith.negf %173 : vector<8x128xf32>
    %175 = math.exp %174 : vector<8x128xf32>
    %cst_37 = arith.constant 1.000000e+00 : f32
    %176 = vector.broadcast %cst_37 : f32 to vector<8x128xf32>
    %177 = arith.addf %176, %175 : vector<8x128xf32>
    %178 = arith.divf %176, %177 : vector<8x128xf32>
    %179 = vector.extract_strided_slice %172 {offsets = [0, 128], sizes = [8, 128], strides = [1, 1]} : vector<8x256xf32> to vector<8x128xf32>
    %180 = arith.negf %179 : vector<8x128xf32>
    %181 = math.exp %180 : vector<8x128xf32>
    %cst_38 = arith.constant 1.000000e+00 : f32
    %182 = vector.broadcast %cst_38 : f32 to vector<8x128xf32>
    %183 = arith.addf %182, %181 : vector<8x128xf32>
    %184 = arith.divf %182, %183 : vector<8x128xf32>
    %185 = math.tanh %179 : vector<8x128xf32>
    %186 = vector.extract_strided_slice %178 {offsets = [0, 0], sizes = [8, 64], strides = [1, 1]} : vector<8x128xf32> to vector<8x64xf32>
    %187 = vector.extract_strided_slice %184 {offsets = [0, 0], sizes = [8, 64], strides = [1, 1]} : vector<8x128xf32> to vector<8x64xf32>
    %188 = vector.extract_strided_slice %185 {offsets = [0, 64], sizes = [8, 64], strides = [1, 1]} : vector<8x128xf32> to vector<8x64xf32>
    %189 = vector.extract_strided_slice %178 {offsets = [0, 64], sizes = [8, 64], strides = [1, 1]} : vector<8x128xf32> to vector<8x64xf32>
    %190 = arith.mulf %189, %166 : vector<8x64xf32>
    %191 = arith.mulf %186, %188 : vector<8x64xf32>
    %192 = arith.addf %190, %191 : vector<8x64xf32>
    %193 = math.tanh %192 : vector<8x64xf32>
    %194 = arith.mulf %187, %193 : vector<8x64xf32>
    %195 = arith.truncf %194 : vector<8x64xf32> to vector<8x64xbf16>
    %cst_39 = arith.constant dense<0.000000e+00> : vector<8x256xf32>
    %196 = tpu.matmul %195, %18, %cst_39 {dimension_numbers = #tpu.dot_dimension_numbers<[1], [0], [0], [1], [0, 0, 1, 1], [], []>} : vector<8x64xbf16>, vector<64x256xbf16>, vector<8x256xf32> -> vector<8x256xf32>
    %c56 = arith.constant 56 : index
    %c0_40 = arith.constant 0 : index
    %197 = vector.load %arg8[%c56, %c0_40] : memref<64x256xf32, #tpu.memory_space<vmem>>, vector<8x256xf32>
    %198 = arith.addf %196, %197 : vector<8x256xf32>
    %199 = vector.extract_strided_slice %198 {offsets = [0, 0], sizes = [8, 128], strides = [1, 1]} : vector<8x256xf32> to vector<8x128xf32>
    %200 = arith.negf %199 : vector<8x128xf32>
    %201 = math.exp %200 : vector<8x128xf32>
    %cst_41 = arith.constant 1.000000e+00 : f32
    %202 = vector.broadcast %cst_41 : f32 to vector<8x128xf32>
    %203 = arith.addf %202, %201 : vector<8x128xf32>
    %204 = arith.divf %202, %203 : vector<8x128xf32>
    %205 = vector.extract_strided_slice %198 {offsets = [0, 128], sizes = [8, 128], strides = [1, 1]} : vector<8x256xf32> to vector<8x128xf32>
    %206 = arith.negf %205 : vector<8x128xf32>
    %207 = math.exp %206 : vector<8x128xf32>
    %cst_42 = arith.constant 1.000000e+00 : f32
    %208 = vector.broadcast %cst_42 : f32 to vector<8x128xf32>
    %209 = arith.addf %208, %207 : vector<8x128xf32>
    %210 = arith.divf %208, %209 : vector<8x128xf32>
    %211 = math.tanh %205 : vector<8x128xf32>
    %212 = vector.extract_strided_slice %204 {offsets = [0, 0], sizes = [8, 64], strides = [1, 1]} : vector<8x128xf32> to vector<8x64xf32>
    %213 = vector.extract_strided_slice %210 {offsets = [0, 0], sizes = [8, 64], strides = [1, 1]} : vector<8x128xf32> to vector<8x64xf32>
    %214 = vector.extract_strided_slice %211 {offsets = [0, 64], sizes = [8, 64], strides = [1, 1]} : vector<8x128xf32> to vector<8x64xf32>
    %215 = vector.extract_strided_slice %204 {offsets = [0, 64], sizes = [8, 64], strides = [1, 1]} : vector<8x128xf32> to vector<8x64xf32>
    %216 = arith.mulf %215, %192 : vector<8x64xf32>
    %217 = arith.mulf %212, %214 : vector<8x64xf32>
    %218 = arith.addf %216, %217 : vector<8x64xf32>
    %219 = math.tanh %218 : vector<8x64xf32>
    %220 = arith.mulf %213, %219 : vector<8x64xf32>
    %c0_43 = arith.constant 0 : index
    %c0_44 = arith.constant 0 : index
    %221 = vector.load %arg5[%c0_43, %c0_44] : memref<64x128xf32, #tpu.memory_space<vmem>>, vector<64x128xf32>
    %cst_45 = arith.constant dense<0.000000e+00> : vector<8x128xf32>
    %222 = tpu.matmul %220, %221, %cst_45 {dimension_numbers = #tpu.dot_dimension_numbers<[1], [0], [0], [1], [0, 0, 1, 1], [], []>} : vector<8x64xf32>, vector<64x128xf32>, vector<8x128xf32> -> vector<8x128xf32>
    %c0_46 = arith.constant 0 : index
    %c0_47 = arith.constant 0 : index
    %223 = vector.load %arg6[%c0_46, %c0_47] : memref<1x128xf32, #tpu.memory_space<vmem>>, vector<1x128xf32>
    %224 = vector.broadcast %223 : vector<1x128xf32> to vector<8x128xf32>
    %225 = arith.addf %222, %224 : vector<8x128xf32>
    %c0_48 = arith.constant 0 : index
    %c0_49 = arith.constant 0 : index
    %226 = vector.load %arg7[%c0_48, %c0_49] : memref<8x128xf32, #tpu.memory_space<vmem>>, vector<8x128xf32>
    tpu.vector_store %arg7[%c0_48, %c0_49], %225 {strides = array<i32>} : memref<8x128xf32, #tpu.memory_space<vmem>>, vector<8x128xf32>,
    return
  }
}

</mosaic_0001>

<bundles_post_ra>
// kernel: rnn_forward.1
= control target key start
LH: loop header
LB: loop body
LE: loop exit
PB: predicated region body
PF: predicated region fallthrough
CT: control target
= control target key end

     0   :  { %12 = vsyncpa [#allocation4], 0  ;;  %s1416_s27 = smov [#allocation3]   ;;  %s1417_s29 = smov 256   ;;  %s1877_s0 = inlined_call_operand.vmem [shape: s32[64,1], index: 0, kind: input, shape index: {}]   ;;  %s1878_s1 = inlined_call_operand.vmem [shape: s32[64,1], index: 1, kind: input, shape index: {}]   ;;  %s1879_s2 = inlined_call_operand.hbm [shape: f32[256,256], index: 2, kind: input, shape index: {}]   ;;  %s1880_s3 = inlined_call_operand.vmem [shape: f32[1,256], index: 3, kind: input, shape index: {}]   ;;  %s1881_s4 = inlined_call_operand.vmem [shape: bf16[64,256], index: 4, kind: input, shape index: {}]   ;;  %s1882_s5 = inlined_call_operand.vmem [shape: f32[64,128], index: 5, kind: input, shape index: {}]   ;;  %s1883_s6 = inlined_call_operand.vmem [shape: f32[1,128], index: 6, kind: input, shape index: {}]   ;;  %s1884_s7 = inlined_call_operand.vmem [shape: f32[8,128], index: 7, kind: output, shape index: {}]  }
   0x1   :  { %s21_s26 = sshll.u32 %s1879_s2, 4  ;;  %s23_s28 = sshll.u32 %s1416_s27, 4  ;;  %s22_s26 = int_to_ptr.hbm [resolvable:$true] %s21_s26  ;;  %s24_s28 = int_to_ptr.vmem [resolvable:$true] %s23_s28 }
   0x2   :  { %s1418_s30 = smov 16  }
   0x3   :  { %29 = dma.hbm_to_vmem [thread:$0]  %s22_s26, 8192, %s24_s28, [#allocation4], %s1417_s29, %s1417_s29, %s1418_s30  }
   0x4   :  { %1414 = dma.done.wait [#allocation4], 8192  }
   0x5   :  { %1415 = vsyncadd [#allocation4], 4294959104  ;;  %v1419_v0 = vmov 0   ;;  %v102_v1 = vld [vmem:[%s1878_s1 + $0x8] sm:$0xff]  ;;  %v45_v2 = vld [vmem:[%s1877_s0] sm:$0xff]  ;;  %s1421_s21 = smov 64  }
   0x6   :  { %1291 = vset.pattern.permute.xlu1 %v1419_v0  ;;  %1290 = vset.pattern.permute.xlu0 %v1419_v0  ;;  %v104_v3 = vld [vmem:[%s1878_s1 + $0x18] sm:$0xff]  ;;  %v187_v4 = vld [vmem:[#allocation3 + $0xf0] sm:$0xff]  ;;  %v185_v6 = vld [vmem:[#allocation3 + $0xe0] sm:$0xff] }
   0x7   :  { %1292 = vset.pattern.permute.xlu2 %v1419_v0  ;;  %113 = vperm.xlu1 %1291, %v102_v1   ;;  %v188_v5 = vld [vmem:[#allocation3 + $0xf8] sm:$0xff]  ;;  %v186_v7 = vld [vmem:[#allocation3 + $0xe8] sm:$0xff]  ;;  %v183_v8 = vld [vmem:[#allocation3 + $0xd0] sm:$0xff] }
   0x8   :  { %54 = vperm.xlu0 %1290, %v45_v2   ;;  %119 = vperm.xlu2 %1292, %v104_v3   ;;  %v103_v9 = vld [vmem:[%s1878_s1 + $0x10] sm:$0xff]  ;;  %v101_v10 = vld [vmem:[%s1878_s1] sm:$0xff]  ;;  %v184_v12 = vld [vmem:[#allocation3 + $0xd8] sm:$0xff] }
   0x9   :  { %227 = vmatpush.msra.mxu0 %v187_v4  ;;  %309 = vmatpush.msra.mxu2 %v188_v5  ;;  %v219_v11 = vld [vmem:[#allocation3 + $0x1f0] sm:$0xff]  ;;  %v181_v13 = vld [vmem:[#allocation3 + $0xc0] sm:$0xff]  ;;  %v220_v14 = vld [vmem:[#allocation3 + $0x1f8] sm:$0xff] }
   0xa   :  { %268 = vmatpush.msra.mxu1 %v219_v11  ;;  %v46_v15 = vld [vmem:[%s1877_s0 + $0x8] sm:$0xff]  ;;  %350 = vmatpush.msra.mxu3 %v220_v14  ;;  %v217_v16 = vld [vmem:[#allocation3 + $0x1e0] sm:$0xff]  ;;  %v179_v18 = vld [vmem:[#allocation3 + $0xb0] sm:$0xff] }
   0xb   :  { %228 = vmatpush.msra.mxu0 %v185_v6  ;;  %310 = vmatpush.msra.mxu2 %v186_v7  ;;  %v182_v17 = vld [vmem:[#allocation3 + $0xc8] sm:$0xff]  ;;  %v215_v20 = vld [vmem:[#allocation3 + $0x1d0] sm:$0xff]  ;;  %v180_v21 = vld [vmem:[#allocation3 + $0xb8] sm:$0xff] }
   0xc   :  { %v218_v19 = vld [vmem:[#allocation3 + $0x1e8] sm:$0xff]  ;;  %v177_v22 = vld [vmem:[#allocation3 + $0xa0] sm:$0xff]  ;;  %269 = vmatpush.msra.mxu1 %v217_v16  ;;  %v216_v23 = vld [vmem:[#allocation3 + $0x1d8] sm:$0xff] }
   0xd   :  { %229 = vmatpush.msra.mxu0 %v183_v8  ;;  %311 = vmatpush.msra.mxu2 %v184_v12  ;;  %v213_v24 = vld [vmem:[#allocation3 + $0x1c0] sm:$0xff]  ;;  %v178_v25 = vld [vmem:[#allocation3 + $0xa8] sm:$0xff]  ;;  %v175_v26 = vld [vmem:[#allocation3 + $0x90] sm:$0xff]  ;;  %v43_v12 = vlaneseq }
   0xe   :  { %351 = vmatpush.msra.mxu3 %v218_v19  ;;  %270 = vmatpush.msra.mxu1 %v215_v20  ;;  %v47_v27 = vld [vmem:[%s1877_s0 + $0x10] sm:$0xff]  ;;  %v105_v28 = vld [vmem:[%s1878_s1 + $0x20] sm:$0xff]  ;;  %v176_v29 = vld [vmem:[#allocation3 + $0x98] sm:$0xff] }
   0xf   :  { %116 = vperm.xlu1 %1291, %v103_v9   ;;  %230 = vmatpush.msra.mxu0 %v181_v13  ;;  %v173_v30 = vld [vmem:[#allocation3 + $0x80] sm:$0xff]  ;;  %v106_v31 = vld [vmem:[%s1878_s1 + $0x28] sm:$0xff]  ;;  %v171_v34 = vld [vmem:[#allocation3 + $0x70] sm:$0xff]  ;;  %v1498_v14 = vand.u32 127, %v43_v12 }
  0x10   :  { %110 = vperm.xlu0 %1290, %v101_v10   ;;  %57 = vperm.xlu2 %1292, %v46_v15   ;;  %v214_v32 = vld [vmem:[#allocation3 + $0x1c8] sm:$0xff]  ;;  %v211_v35 = vld [vmem:[#allocation3 + $0x1b0] sm:$0xff]  ;;  %v212_v36 = vld [vmem:[#allocation3 + $0x1b8] sm:$0xff] }
  0x11   :  { %312 = vmatpush.msra.mxu2 %v182_v17  ;;  %231 = vmatpush.msra.mxu0 %v179_v18  ;;  %v174_v33 = vld [vmem:[#allocation3 + $0x88] sm:$0xff]  ;;  %v172_v37 = vld [vmem:[#allocation3 + $0x78] sm:$0xff]  ;;  %v169_v38 = vld [vmem:[#allocation3 + $0x60] sm:$0xff]  ;;  %v1420_v17 = vmov 1.0  }
  0x12   :  { %352 = vmatpush.msra.mxu3 %v216_v23  ;;  %271 = vmatpush.msra.mxu1 %v213_v24  ;;  %v209_v39 = vld [vmem:[#allocation3 + $0x1a0] sm:$0xff]  ;;  %v210_v40 = vld [vmem:[#allocation3 + $0x1a8] sm:$0xff]  ;;  %v167_v42 = vld [vmem:[#allocation3 + $0x50] sm:$0xff] }
  0x13   :  { %313 = vmatpush.msra.mxu2 %v180_v21  ;;  %232 = vmatpush.msra.mxu0 %v177_v22  ;;  %v170_v41 = vld [vmem:[#allocation3 + $0x68] sm:$0xff]  ;;  %v48_v43 = vld [vmem:[%s1877_s0 + $0x18] sm:$0xff]  ;;  %v207_v44 = vld [vmem:[#allocation3 + $0x190] sm:$0xff] }
  0x14   :  { %353 = vmatpush.msra.mxu3 %v214_v32  ;;  %272 = vmatpush.msra.mxu1 %v211_v35  ;;  %v168_v45 = vld [vmem:[#allocation3 + $0x58] sm:$0xff]  ;;  %v49_v47 = vld [vmem:[%s1877_s0 + $0x20] sm:$0xff]  ;;  %v166_v50 = vld [vmem:[#allocation3 + $0x48] sm:$0xff] }
  0x15   :  { %314 = vmatpush.msra.mxu2 %v178_v25  ;;  %233 = vmatpush.msra.mxu0 %v175_v26  ;;  %v208_v46 = vld [vmem:[#allocation3 + $0x198] sm:$0xff]  ;;  %v165_v48 = vld [vmem:[#allocation3 + $0x40] sm:$0xff]  ;;  %v206_v51 = vld [vmem:[#allocation3 + $0x188] sm:$0xff] }
  0x16   :  { %354 = vmatpush.msra.mxu3 %v212_v36  ;;  %273 = vmatpush.msra.mxu1 %v209_v39  ;;  %v205_v49 = vld [vmem:[#allocation3 + $0x180] sm:$0xff]  ;;  %v163_v52 = vld [vmem:[#allocation3 + $0x30] sm:$0xff]  ;;  %v164_v54 = vld [vmem:[#allocation3 + $0x38] sm:$0xff] }
  0x17   :  { %60 = vperm.xlu1 %1291, %v47_v27   ;;  %315 = vmatpush.msra.mxu2 %v176_v29  ;;  %v203_v53 = vld [vmem:[#allocation3 + $0x170] sm:$0xff]  ;;  %v204_v55 = vld [vmem:[#allocation3 + $0x178] sm:$0xff]  ;;  %v161_v56 = vld [vmem:[#allocation3 + $0x20] sm:$0xff] }
  0x18   :  { %122 = vperm.xlu0 %1290, %v105_v28   ;;  %234 = vmatpush.msra.mxu0 %v173_v30  ;;  %v201_v57 = vld [vmem:[#allocation3 + $0x160] sm:$0xff]  ;;  %v162_v58 = vld [vmem:[#allocation3 + $0x28] sm:$0xff]  ;;  %v159_v60 = vld [vmem:[#allocation3 + $0x10] sm:$0xff] }
  0x19   :  { %125 = vperm.xlu2 %1292, %v106_v31   ;;  %316 = vmatpush.msra.mxu2 %v174_v33  ;;  %v202_v59 = vld [vmem:[#allocation3 + $0x168] sm:$0xff]  ;;  %v199_v61 = vld [vmem:[#allocation3 + $0x150] sm:$0xff]  ;;  %v160_v62 = vld [vmem:[#allocation3 + $0x18] sm:$0xff] }
  0x1a   :  { %235 = vmatpush.msra.mxu0 %v171_v34  ;;  %355 = vmatpush.msra.mxu3 %v210_v40  ;;  %v200_v63 = vld [vmem:[#allocation3 + $0x158] sm:$0xff]  ;;  %v157_v0 = vld [vmem:[#allocation3] sm:$0xff]  ;;  %v158_v2 = vld [vmem:[#allocation3 + $0x8] sm:$0xff] }
  0x1b   :  { %317 = vmatpush.msra.mxu2 %v172_v37  ;;  %274 = vmatpush.msra.mxu1 %v207_v44  ;;  %v197_v1 = vld [vmem:[#allocation3 + $0x140] sm:$0xff]  ;;  %v198_v3 = vld [vmem:[#allocation3 + $0x148] sm:$0xff]  ;;  %v195_v4 = vld [vmem:[#allocation3 + $0x130] sm:$0xff] }
  0x1c   :  { %236 = vmatpush.msra.mxu0 %v169_v38  ;;  %356 = vmatpush.msra.mxu3 %v208_v46  ;;  %v196_v5 = vld [vmem:[#allocation3 + $0x138] sm:$0xff]  ;;  %v193_v6 = vld [vmem:[#allocation3 + $0x120] sm:$0xff]  ;;  %v194_v7 = vld [vmem:[#allocation3 + $0x128] sm:$0xff] }
  0x1d   :  { %318 = vmatpush.msra.mxu2 %v170_v41  ;;  %275 = vmatpush.msra.mxu1 %v205_v49  ;;  %v191_v8 = vld [vmem:[#allocation3 + $0x110] sm:$0xff]  ;;  %v192_v9 = vld [vmem:[#allocation3 + $0x118] sm:$0xff]  ;;  %v189_v10 = vld [vmem:[#allocation3 + $0x100] sm:$0xff] }
  0x1e   :  { %237 = vmatpush.msra.mxu0 %v167_v42  ;;  %357 = vmatpush.msra.mxu3 %v206_v51  ;;  %v190_v11 = vld [vmem:[#allocation3 + $0x108] sm:$0xff]  ;;  %v107_v21 = vld [vmem:[%s1878_s1 + $0x30] sm:$0xff]  ;;  %v108_v24 = vld [vmem:[%s1878_s1 + $0x38] sm:$0xff] }
  0x1f   :  { %319 = vmatpush.msra.mxu2 %v168_v45  ;;  %276 = vmatpush.msra.mxu1 %v203_v53  ;;  %v52_v27 = vld [vmem:[%s1877_s0 + $0x38] sm:$0xff]  ;;  %v50_v29 = vld [vmem:[%s1877_s0 + $0x28] sm:$0xff]  ;;  %v221_v32 = vld [vmem:[%s1880_s3] sm:$0x3] }
  0x20   :  { %63 = vperm.xlu0 %1290, %v48_v43   ;;  %238 = vmatpush.msra.mxu0 %v165_v48  ;;  %v1552_v35 = vperm.slane %v221_v32, 1  ;;  %v1554_v36 = vperm.slane %v221_v32, 0  ;;  %v1282_v43 = vld [vmem:[%s1881_s4 + $0x34] sm:$0xf]  ;;  %v1243_v44 = vld [vmem:[%s1881_s4 + $0x38] sm:$0xf0] }
  0x21   :  { %66 = vperm.xlu2 %1292, %v49_v47   ;;  %320 = vmatpush.msra.mxu2 %v166_v50  ;;  %v1570_v47 = vor.u32 %v1282_v43, %v1243_v44  ;;  %v1280_v48 = vld [vmem:[%s1881_s4 + $0x24] sm:$0xf]  ;;  %v1235_v49 = vld [vmem:[%s1881_s4 + $0x28] sm:$0xf0]  ;;  %v1279_v32 = vld [vmem:[%s1881_s4 + $0x14] sm:$0xf0] }
  0x22   :  { %239 = vmatpush.msra.mxu0 %v163_v52  ;;  %358 = vmatpush.msra.mxu3 %v204_v55  ;;  %v1583_v51 = vor.u32 %v1280_v48, %v1235_v49 }
  0x23   :  { %321 = vmatpush.msra.mxu2 %v164_v54  ;;  %277 = vmatpush.msra.mxu1 %v201_v57 }
  0x24   :  { %240 = vmatpush.msra.mxu0 %v161_v56  ;;  %359 = vmatpush.msra.mxu3 %v202_v59 }
  0x25   :  { %322 = vmatpush.msra.mxu2 %v162_v58  ;;  %278 = vmatpush.msra.mxu1 %v199_v61 }
  0x26   :  { %241 = vmatpush.msra.mxu0 %v159_v60  ;;  %360 = vmatpush.msra.mxu3 %v200_v63  ;;  %v51_v60 = vld [vmem:[%s1877_s0 + $0x30] sm:$0xff] }
  0x27   :  { %323 = vmatpush.msra.mxu2 %v160_v62  ;;  %279 = vmatpush.msra.mxu1 %v197_v1 }
  0x28   :  { %242 = vmatpush.msra.mxu0 %v157_v0  ;;  %361 = vmatpush.msra.mxu3 %v198_v3 }
  0x29   :  { %324 = vmatpush.msra.mxu2 %v158_v2  ;;  %280 = vmatpush.msra.mxu1 %v195_v4 }
  0x2a   :  { %362 = vmatpush.msra.mxu3 %v196_v5  ;;  %128 = vperm.xlu1 %1291, %v107_v21   ;;  %v1278_v5 = vld [vmem:[%s1881_s4 + $0x14] sm:$0xf]  ;;  %v1241_v21 = vld [vmem:[%s1881_s4 + $0x30] sm:$0xf] }
  0x2b   :  { %281 = vmatpush.msra.mxu1 %v193_v6  ;;  %69 = vperm.xlu2 %1292, %v50_v29   ;;  %v1227_v6 = vld [vmem:[%s1881_s4 + $0x18] sm:$0xf0] }
  0x2c   :  { %363 = vmatpush.msra.mxu3 %v194_v7  ;;  %v1276_v7 = vld [vmem:[%s1881_s4 + $0x4] sm:$0xf] }
  0x2d   :  { %282 = vmatpush.msra.mxu1 %v191_v8  ;;  %v1619_v8 = vor.u32 %v1278_v5, %v1227_v6 }
  0x2e   :  { %364 = vmatpush.msra.mxu3 %v192_v9  ;;  %v1219_v9 = vld [vmem:[%s1881_s4 + $0x8] sm:$0xf0] }
  0x2f   :  { %283 = vmatpush.msra.mxu1 %v189_v10  ;;  %v1625_v10 = vor.u32 %v1276_v7, %v1219_v9 }
  0x30   :  { %365 = vmatpush.msra.mxu3 %v190_v11 }
  0x31   :  { %527 = vmatpush.bf16.msrb.mxu1 %v1570_v47 }
  0x32   :  { %131 = vperm.xlu1 %1291, %v108_v24   ;;  %619 = vmatpush.bf16.msrb.mxu3 %v1570_v47 }
  0x35   :  { %528 = vmatpush.bf16.msrb.mxu1 %v1583_v51 }
  0x36   :  { %620 = vmatpush.bf16.msrb.mxu3 %v1583_v51 }
  0x39   :  { %529 = vmatpush.bf16.msrb.mxu1 %v1619_v8 }
  0x3a   :  { %75 = vperm.xlu1 %1291, %v52_v27   ;;  %621 = vmatpush.bf16.msrb.mxu3 %v1619_v8  ;;  %v1233_v27 = vld [vmem:[%s1881_s4 + $0x20] sm:$0xf] }
  0x3d   :  { %530 = vmatpush.bf16.msrb.mxu1 %v1625_v10 }
  0x3e   :  { %622 = vmatpush.bf16.msrb.mxu3 %v1625_v10 }
  0x62   :  { %v120_v13 = vpop.permute.xlu2 %119 }
  0x63   :  { %vm136_vm7 = vcmp.eq.s32.totalorder %v120_v13, %v1498_v14 }
  0x6a   :  { %v58_v18 = vpop.permute.xlu2 %57 }
  0x6b   :  { %vm78_vm1 = vcmp.eq.s32.totalorder %v58_v18, %v1498_v14 }
  0x73   :  { %v126_v25 = vpop.permute.xlu2 %125 }
  0x74   :  { %vm138_vm10 = vcmp.eq.s32.totalorder %v126_v25, %v1498_v14 }
  0x79   :  { %v114_v15 = vpop.permute.xlu1 %113 }
  0x7a   :  { %v55_v16 = vpop.permute.xlu0 %54  ;;  %vm134_vm3 = vcmp.eq.s32.totalorder %v114_v15, %v1498_v14 }
  0x7b   :  { %vm77_vm0 = vcmp.eq.s32.totalorder %v55_v16, %v1498_v14  ;;  %v67_v28 = vpop.permute.xlu2 %66 }
  0x7c   :  { %1181 = vmatmul.msk.f32.vlgmr.msra.gmra.mxu0 %vm77_vm0, %v1420_v17  ;;  %1197 = vmatmul.msk.f32.vlgmr.msra.gmra.mxu2 %vm77_vm0, %v1420_v17  ;;  %vm81_vm8 = vcmp.eq.s32.totalorder %v67_v28, %v1498_v14  ;;  %v1281_v28 = vld [vmem:[%s1881_s4 + $0x24] sm:$0xf0] }
  0x7d   :  { %v1661_v29 = vor.u32 %v1281_v28, %v1233_v27 }
  0x81   :  { %v117_v19 = vpop.permute.xlu1 %116 }
  0x82   :  { %v111_v20 = vpop.permute.xlu0 %110  ;;  %vm135_vm5 = vcmp.eq.s32.totalorder %v117_v19, %v1498_v14 }
  0x83   :  { %vm133_vm2 = vcmp.eq.s32.totalorder %v111_v20, %v1498_v14 }
  0x84   :  { %1182 = vmatmul.msk.f32.gmra.mxu0 %vm78_vm1, %v1420_v17  ;;  %1189 = vmatmul.msk.f32.vlgmr.msra.gmra.mxu1 %vm133_vm2, %v1420_v17 }
  0x85   :  { %1198 = vmatmul.msk.f32.gmra.mxu2 %vm78_vm1, %v1420_v17  ;;  %1205 = vmatmul.msk.f32.vlgmr.msra.gmra.mxu3 %vm133_vm2, %v1420_v17  ;;  %v70_v11 = vpop.permute.xlu2 %69 }
  0x86   :  { %707 = vmatpush.bf16.msra.mxu1 %v1570_v47  ;;  %795 = vmatpush.bf16.msra.mxu3 %v1570_v47  ;;  %vm82_vm13 = vcmp.eq.s32.totalorder %v70_v11, %v1498_v14 }
  0x89   :  { %v61_v22 = vpop.permute.xlu1 %60 }
  0x8a   :  { %v123_v23 = vpop.permute.xlu0 %122  ;;  %vm79_vm4 = vcmp.eq.s32.totalorder %v61_v22, %v1498_v14  ;;  %708 = vmatpush.bf16.msra.mxu1 %v1583_v51  ;;  %796 = vmatpush.bf16.msra.mxu3 %v1583_v51  ;;  %v1283_v22 = vld [vmem:[%s1881_s4 + $0x34] sm:$0xf0] }
  0x8b   :  { %vm137_vm9 = vcmp.eq.s32.totalorder %v123_v23, %v1498_v14  ;;  %v1651_v24 = vor.u32 %v1283_v22, %v1241_v21 }
  0x8c   :  { %1183 = vmatmul.msk.f32.gmra.mxu0 %vm79_vm4, %v1420_v17  ;;  %1190 = vmatmul.msk.f32.gmra.mxu1 %vm134_vm3, %v1420_v17 }
  0x8d   :  { %1199 = vmatmul.msk.f32.gmra.mxu2 %vm79_vm4, %v1420_v17  ;;  %1206 = vmatmul.msk.f32.gmra.mxu3 %vm134_vm3, %v1420_v17 }
  0x8e   :  { %709 = vmatpush.bf16.msra.mxu1 %v1619_v8  ;;  %797 = vmatpush.bf16.msra.mxu3 %v1619_v8 }
  0x8f   :  { %514 = vmatpush.bf16.msrb.mxu0 %v1651_v24  ;;  %606 = vmatpush.bf16.msrb.mxu2 %v1651_v24 }
  0x92   :  { %v64_v26 = vpop.permute.xlu0 %63  ;;  %710 = vmatpush.bf16.msra.mxu1 %v1625_v10  ;;  %798 = vmatpush.bf16.msra.mxu3 %v1625_v10 }
  0x93   :  { %vm80_vm6 = vcmp.eq.s32.totalorder %v64_v26, %v1498_v14  ;;  %515 = vmatpush.bf16.msrb.mxu0 %v1661_v29  ;;  %607 = vmatpush.bf16.msrb.mxu2 %v1661_v29 }
  0x94   :  { %1184 = vmatmul.msk.f32.gmra.mxu0 %vm80_vm6, %v1420_v17  ;;  %1191 = vmatmul.msk.f32.gmra.mxu1 %vm135_vm5, %v1420_v17 }
  0x95   :  { %1200 = vmatmul.msk.f32.gmra.mxu2 %vm80_vm6, %v1420_v17  ;;  %1207 = vmatmul.msk.f32.gmra.mxu3 %vm135_vm5, %v1420_v17 }
  0x9c   :  { %1192 = vmatmul.msk.f32.gmra.mxu1 %vm136_vm7, %v1420_v17  ;;  %1185 = vmatmul.msk.f32.gmra.mxu0 %vm81_vm8, %v1420_v17  ;;  %v129_v46 = vpop.permute.xlu1 %128 }
  0x9d   :  { %1208 = vmatmul.msk.f32.gmra.mxu3 %vm136_vm7, %v1420_v17  ;;  %1201 = vmatmul.msk.f32.gmra.mxu2 %vm81_vm8, %v1420_v17  ;;  %vm139_vm11 = vcmp.eq.s32.totalorder %v129_v46, %v1498_v14  ;;  %vm506_vm7 = vcmask 523264  }
  0xa4   :  { %1193 = vmatmul.msk.f32.gmra.mxu1 %vm137_vm9, %v1420_v17  ;;  %v132_v58 = vpop.permute.xlu1 %131  ;;  %1186 = vmatmul.msk.f32.gmra.mxu0 %vm82_vm13, %v1420_v17 }
  0xa5   :  { %1209 = vmatmul.msk.f32.gmra.mxu3 %vm137_vm9, %v1420_v17  ;;  %vm140_vm12 = vcmp.eq.s32.totalorder %v132_v58, %v1498_v14  ;;  %1202 = vmatmul.msk.f32.gmra.mxu2 %vm82_vm13, %v1420_v17 }
  0xac   :  { %1194 = vmatmul.msk.f32.gmra.mxu1 %vm138_vm10, %v1420_v17  ;;  %v76_v9 = vpop.permute.xlu1 %75 }
  0xad   :  { %1210 = vmatmul.msk.f32.gmra.mxu3 %vm138_vm10, %v1420_v17  ;;  %vm84_vm8 = vcmp.eq.s32.totalorder %v76_v9, %v1498_v14 }
  0xb4   :  { %1195 = vmatmul.msk.f32.gmra.mxu1 %vm139_vm11, %v1420_v17 }
  0xb5   :  { %1211 = vmatmul.msk.f32.gmra.mxu3 %vm139_vm11, %v1420_v17 }
  0xbc   :  { %1196 = vmatmul.msk.f32.gmra.mxu1 %vm140_vm12, %v1420_v17 }
  0xbd   :  { %1212 = vmatmul.msk.f32.gmra.mxu3 %vm140_vm12, %v1420_v17 }
  0xf9   :  { %v1545_v30 = vpop.f32.mrf.mxu0 }
  0xfa   :  { %v245_v12 = vadd.f32 %v1545_v30, %v1554_v36 }
  0xff   :  { %v326_v31 = vpop.f32.mrf.mxu2 }
 0x100   :  { %v327_v38 = vadd.f32 %v326_v31, %v1552_v35  ;;  %v1225_v31 = vld [vmem:[%s1881_s4 + $0x10] sm:$0xf] }
 0x101   :  { %v247_v33 = vpop.f32.mrf.mxu0  ;;  %v1550_v34 = vpop.f32.mrf.mxu1 }
 0x102   :  { %v248_v37 = vadd.f32 %v247_v33, %v1554_v36  ;;  %v286_v13 = vadd.f32 %v1550_v34, %v245_v12  ;;  %v1671_v33 = vor.u32 %v1279_v32, %v1225_v31  ;;  %v1217_v34 = vld [vmem:[%s1881_s4] sm:$0xf] }
 0x104   :  { %v1213_v15 = vmul.f32 -1.442695, %v286_v13  ;;  %516 = vmatpush.bf16.msrb.mxu0 %v1671_v33  ;;  %608 = vmatpush.bf16.msrb.mxu2 %v1671_v33 }
 0x108   :  { %v1558_v39 = vpop.f32.mrf.mxu2  ;;  %v367_v40 = vpop.f32.mrf.mxu3 }
 0x109   :  { %v1560_v41 = vadd.f32 %v367_v40, %v327_v38  ;;  %v288_v42 = vpop.f32.mrf.mxu1  ;;  %v250_v50 = vpop.f32.mrf.mxu0 }
 0x10a   :  { %v1568_v45 = vadd.f32 %v288_v42, %v248_v37  ;;  %v251_v52 = vadd.f32 %v250_v50, %v1554_v36  ;;  %v1277_v37 = vld [vmem:[%s1881_s4 + $0x4] sm:$0xf0] }
 0x10b   :  { %1294 = vtanh.f32 %v1560_v41  ;;  %v1214_v16 = vmul.f32 -1.442695, %v1560_v41  ;;  %v1680_v40 = vor.u32 %v1277_v37, %v1217_v34 }
 0x10c   :  { %1296 = vpow2.f32 %v1213_v15 }
 0x10d   :  { %1298 = vpow2.f32 %v1214_v16  ;;  %517 = vmatpush.bf16.msrb.mxu0 %v1680_v40  ;;  %609 = vmatpush.bf16.msrb.mxu2 %v1680_v40  ;;  %v330_v16 = vadd.f32 %v1558_v39, %v1552_v35 }
 0x110   :  { %v1587_v53 = vpop.f32.mrf.mxu3  ;;  %v1591_v56 = vpop.f32.mrf.mxu2 }
 0x111   :  { %v1295_v54 = vpop.eup %1294  ;;  %v291_v55 = vpop.f32.mrf.mxu1  ;;  %694 = vmatpush.bf16.msra.mxu0 %v1651_v24  ;;  %782 = vmatpush.bf16.msra.mxu2 %v1651_v24 }
 0x112   :  { %457 = vrot.lane.b32.xlu0 %v1295_v54, %s1421_s21  ;;  %v1594_v57 = vadd.f32 %v291_v55, %v251_v52  ;;  %v253_v59 = vpop.f32.mrf.mxu0  ;;  %v1297_v18 = vpop.eup %1296 }
 0x113   :  { %v254_v61 = vadd.f32 %v253_v59, %v1554_v36  ;;  %v420_v19 = vadd.f32 1.0, %v1297_v18  ;;  %v1299_v20 = vpop.eup %1298 }
 0x114   :  { %v439_v23 = vadd.f32 1.0, %v1299_v20 }
 0x115   :  { %1300 = vrcp.f32 %v420_v19  ;;  %v432_v46 = vand.u32 2147483648, %v420_v19  ;;  %vm426_vm15 = vweird.f32 %v420_v19  ;;  %v430_v48 = vand.u32 2147483647, %v420_v19  ;;  %695 = vmatpush.bf16.msra.mxu0 %v1661_v29  ;;  %783 = vmatpush.bf16.msra.mxu2 %v1661_v29 }
 0x116   :  { %1302 = vrcp.f32 %v439_v23  ;;  %vm445_vm3 = vweird.f32 %v439_v23 }
 0x117   :  { %v433_v50 = vor.u32 1.1754944e-38, %v432_v46  ;;  %vm431_vm1 = vcmp.eq.f32.partialorder %v430_v48, 8.507059e+37 }
 0x118   :  { %v1603_v62 = vpop.f32.mrf.mxu3  ;;  %v335_v1 = vpop.f32.mrf.mxu2 }
 0x119   :  { %v294_v63 = vpop.f32.mrf.mxu1  ;;  %v336_v2 = vadd.f32 %v335_v1, %v1552_v35  ;;  %696 = vmatpush.bf16.msra.mxu0 %v1671_v33  ;;  %784 = vmatpush.bf16.msra.mxu2 %v1671_v33 }
 0x11a   :  { %72 = vperm.xlu0 %1290, %v51_v60   ;;  %v1605_v0 = vadd.f32 %v294_v63, %v254_v61  ;;  %v451_v60 = vand.u32 2147483648, %v439_v23  ;;  %v449_v61 = vand.u32 2147483647, %v439_v23 }
 0x11b   :  { %v1301_v25 = vpop.eup %1300 }
 0x11c   :  { %v422_v26 = vmul.f32 %v1301_v25, %v420_v19  ;;  %v1303_v38 = vpop.eup %1302  ;;  %vm427_vm14 = vweird.f32 %v1301_v25  ;;  %v452_v1 = vor.u32 1.1754944e-38, %v451_v60  ;;  %vm450_vm5 = vcmp.eq.f32.partialorder %v449_v61, 8.507059e+37 }
 0x11d   :  { %v441_v42 = vmul.f32 %v1303_v38, %v439_v23  ;;  %vm428_vm0 = vmor %vm426_vm15, %vm427_vm14  ;;  %vm446_vm2 = vweird.f32 %v1303_v38  ;;  %697 = vmatpush.bf16.msra.mxu0 %v1680_v40  ;;  %785 = vmatpush.bf16.msra.mxu2 %v1680_v40  ;;  %v371_v19 = vadd.f32 %v1587_v53, %v330_v16 }
 0x11e   :  { %v423_v30 = vsub.f32 1.0, %v422_v26  ;;  %vm447_vm4 = vmor %vm445_vm3, %vm446_vm2 }
 0x11f   :  { %v442_v44 = vsub.f32 1.0, %v441_v42 }
 0x120   :  { %v376_v3 = vpop.f32.mrf.mxu3  ;;  %v424_v41 = vmul.f32 %v1301_v25, %v423_v30 }
 0x121   :  { %v1608_v4 = vadd.f32 %v376_v3, %v336_v2  ;;  %v443_v52 = vmul.f32 %v1303_v38, %v442_v44 }
 0x122   :  { %v425_v43 = vadd.f32 %v1301_v25, %v424_v41 }
 0x123   :  { %v444_v59 = vadd.f32 %v1303_v38, %v443_v52 }
 0x124   :  { %v429_v49 = vsel %vm428_vm0, %v1301_v25, %v425_v43 }
 0x125   :  { %v434_v54 = vsel %vm431_vm1, %v433_v50, %v429_v49  ;;  %v448_v63 = vsel %vm447_vm4, %v1303_v38, %v444_v59 }
 0x126   :  { %v453_v5 = vsel %vm450_vm5, %v452_v1, %v448_v63 }
 0x184   :  { %v458_v55 = vpop.permute.xlu0 %457 }
 0x185   :  { %v460_v58 = vmul.f32 %v458_v55, %v434_v54 }
 0x187   :  { %1304 = vtanh.f32 %v460_v58  ;;  %576 = vrot.lane.b32.xlu0 %v460_v58, %s1421_s21 }
 0x18c   :  { %v73_v2 = vpop.permute.xlu0 %72 }
 0x18d   :  { %v1305_v3 = vpop.eup %1304  ;;  %vm83_vm6 = vcmp.eq.s32.totalorder %v73_v2, %v1498_v14  ;;  %v1710_v14 = vpop.f32.mrf.mxu1 }
 0x18e   :  { %1187 = vmatmul.msk.f32.gmra.mxu0 %vm83_vm6, %v1420_v17  ;;  %1203 = vmatmul.msk.f32.gmra.mxu2 %vm83_vm6, %v1420_v17  ;;  %v462_v6 = vmul.f32 %v1305_v3, %v453_v5 }
 0x190   :  { %v463_v7 = vpack.c.bf16 %v462_v6, %v462_v6 }
 0x192   :  { %1248 = vmatmul.msk.bf16.vlgmr.msrb.gmra.mxu1 %vm506_vm7, %v463_v7 }
 0x193   :  { %883 = vmatpush.bf16.msrb.mxu1 %v1570_v47 }
 0x195   :  { %v1712_v11 = vpop.f32.mrf.mxu1 }
 0x196   :  { %1188 = vmatmul.msk.f32.gmra.mxu0 %vm84_vm8, %v1420_v17  ;;  %1204 = vmatmul.msk.f32.gmra.mxu2 %vm84_vm8, %v1420_v17  ;;  %v1714_v17 = vpop.f32.mrf.mxu0 }
 0x197   :  { %884 = vmatpush.bf16.msrb.mxu1 %v1583_v51 }
 0x19b   :  { %885 = vmatpush.bf16.msrb.mxu1 %v1619_v8 }
 0x19d   :  { %v1716_v12 = vpop.f32.mrf.mxu1 }
 0x19e   :  { %1247 = vmatmul.msk.bf16.vlgmr.msrb.gmra.mxu0 %vm506_vm7, %v463_v7  ;;  %v1718_v13 = vpop.f32.mrf.mxu0 }
 0x19f   :  { %870 = vmatpush.bf16.msrb.mxu0 %v1651_v24  ;;  %886 = vmatpush.bf16.msrb.mxu1 %v1625_v10 }
 0x1a3   :  { %871 = vmatpush.bf16.msrb.mxu0 %v1661_v29 }
 0x1a5   :  { %v306_v15 = vpop.f32.mrf.mxu1 }
 0x1a7   :  { %872 = vmatpush.bf16.msrb.mxu0 %v1671_v33 }
 0x1ab   :  { %873 = vmatpush.bf16.msrb.mxu0 %v1680_v40 }
 0x1f9   :  { %v577_v52 = vpop.permute.xlu0 %576 }
 0x20b   :  { %v1722_v18 = vpop.f32.mrf.mxu0 }
 0x20f   :  { %v532_v20 = vpop.f32.mrf.mxu1 }
 0x210   :  { %v533_v21 = vadd.f32 %v532_v20, %v371_v19 }
 0x212   :  { %1306 = vtanh.f32 %v533_v21  ;;  %v1250_v60 = vmul.f32 -1.442695, %v533_v21 }
 0x213   :  { %v265_v22 = vpop.f32.mrf.mxu0 }
 0x214   :  { %v266_v23 = vadd.f32 %v265_v22, %v1554_v36 }
 0x216   :  { %v1726_v25 = vadd.f32 %v306_v15, %v266_v23  ;;  %v1745_v23 = vpop.f32.mrf.mxu3 }
 0x217   :  { %v534_v26 = vpop.f32.mrf.mxu1 }
 0x218   :  { %v1307_v27 = vpop.eup %1306  ;;  %v1747_v26 = vpop.f32.mrf.mxu2 }
 0x219   :  { %581 = vrot.lane.b32.xlu2 %v1307_v27, %s1421_s21 }
 0x21b   :  { %v519_v28 = vpop.f32.mrf.mxu0 }
 0x21c   :  { %v520_v39 = vadd.f32 %v519_v28, %v1568_v45 }
 0x21e   :  { %v1249_v31 = vmul.f32 -1.442695, %v520_v39  ;;  %v1749_v27 = vpop.f32.mrf.mxu3 }
 0x220   :  { %1308 = vpow2.f32 %v1249_v31  ;;  %v1751_v28 = vpop.f32.mrf.mxu2 }
 0x223   :  { %v521_v30 = vpop.f32.mrf.mxu0 }
 0x226   :  { %v1309_v32 = vpop.eup %1308  ;;  %v1753_v30 = vpop.f32.mrf.mxu3 }
 0x227   :  { %v539_v53 = vadd.f32 1.0, %v1309_v32 }
 0x228   :  { %v1755_v39 = vpop.f32.mrf.mxu2 }
 0x229   :  { %1310 = vrcp.f32 %v539_v53  ;;  %v551_v43 = vand.u32 2147483648, %v539_v53  ;;  %vm545_vm10 = vweird.f32 %v539_v53  ;;  %v549_v44 = vand.u32 2147483647, %v539_v53 }
 0x22b   :  { %v552_v48 = vor.u32 1.1754944e-38, %v551_v43  ;;  %vm550_vm12 = vcmp.eq.f32.partialorder %v549_v44, 8.507059e+37 }
 0x22e   :  { %v1757_v31 = vpop.f32.mrf.mxu3 }
 0x22f   :  { %v1311_v34 = vpop.eup %1310 }
 0x230   :  { %v541_v37 = vmul.f32 %v1311_v34, %v539_v53  ;;  %vm546_vm9 = vweird.f32 %v1311_v34  ;;  %v1759_v32 = vpop.f32.mrf.mxu2  ;;  %v333_v53 = vadd.f32 %v1591_v56, %v1552_v35 }
 0x231   :  { %vm547_vm11 = vmor %vm545_vm10, %vm546_vm9 }
 0x232   :  { %v542_v38 = vsub.f32 1.0, %v541_v37 }
 0x234   :  { %v543_v41 = vmul.f32 %v1311_v34, %v542_v38 }
 0x236   :  { %v544_v42 = vadd.f32 %v1311_v34, %v543_v41 }
 0x238   :  { %v548_v46 = vsel %vm547_vm11, %v1311_v34, %v544_v42  ;;  %v374_v34 = vadd.f32 %v1603_v62, %v333_v53 }
 0x239   :  { %v553_v45 = vsel %vm550_vm12, %v552_v48, %v548_v46 }
 0x23a   :  { %v579_v54 = vmul.f32 %v577_v52, %v553_v45 }
 0x273   :  { %v582_v49 = vpop.permute.xlu2 %581 }
 0x274   :  { %v584_v50 = vmul.f32 %v582_v49, %v553_v45 }
 0x276   :  { %586 = vrot.lane.b32.xlu1 %v584_v50, %s1421_s21 }
 0x2e8   :  { %v587_v55 = vpop.permute.xlu1 %586 }
 0x2e9   :  { %v1731_v58 = vadd.f32 %v587_v55, %v579_v54 }
 0x2eb   :  { %1312 = vtanh.f32 %v1731_v58 }
 0x2ec   :  { %1314 = vpow2.f32 %v1250_v60 }
 0x2f1   :  { %v1313_v59 = vpop.eup %1312 }
 0x2f2   :  { %592 = vrot.lane.b32.xlu2 %v1313_v59, %s1421_s21  ;;  %v1315_v61 = vpop.eup %1314 }
 0x2f3   :  { %v558_v63 = vadd.f32 1.0, %v1315_v61 }
 0x2f5   :  { %1316 = vrcp.f32 %v558_v63  ;;  %v570_v7 = vand.u32 2147483648, %v558_v63  ;;  %vm564_vm14 = vweird.f32 %v558_v63  ;;  %v568_v9 = vand.u32 2147483647, %v558_v63 }
 0x2f7   :  { %v571_v16 = vor.u32 1.1754944e-38, %v570_v7  ;;  %vm569_vm0 = vcmp.eq.f32.partialorder %v568_v9, 8.507059e+37 }
 0x2fb   :  { %v1317_v1 = vpop.eup %1316 }
 0x2fc   :  { %v560_v2 = vmul.f32 %v1317_v1, %v558_v63  ;;  %vm565_vm13 = vweird.f32 %v1317_v1 }
 0x2fd   :  { %vm566_vm15 = vmor %vm564_vm14, %vm565_vm13 }
 0x2fe   :  { %v561_v3 = vsub.f32 1.0, %v560_v2 }
 0x300   :  { %v562_v5 = vmul.f32 %v1317_v1, %v561_v3 }
 0x302   :  { %v563_v6 = vadd.f32 %v1317_v1, %v562_v5 }
 0x304   :  { %v567_v15 = vsel %vm566_vm15, %v1317_v1, %v563_v6 }
 0x305   :  { %v572_v19 = vsel %vm569_vm0, %v571_v16, %v567_v15 }
 0x34c   :  { %v593_v20 = vpop.permute.xlu2 %592 }
 0x34d   :  { %v595_v21 = vmul.f32 %v593_v20, %v572_v19 }
 0x34f   :  { %v596_v22 = vpack.c.bf16 %v595_v21, %v595_v21 }
 0x351   :  { %1251 = vmatmul.msk.bf16.vlgmr.msrb.gmra.mxu2 %vm506_vm7, %v596_v22  ;;  %1252 = vmatmul.msk.bf16.vlgmr.msrb.gmra.mxu3 %vm506_vm7, %v596_v22 }
 0x352   :  { %971 = vmatpush.bf16.msrb.mxu3 %v1570_v47  ;;  %958 = vmatpush.bf16.msrb.mxu2 %v1651_v24 }
 0x356   :  { %972 = vmatpush.bf16.msrb.mxu3 %v1583_v51  ;;  %959 = vmatpush.bf16.msrb.mxu2 %v1661_v29 }
 0x35a   :  { %973 = vmatpush.bf16.msrb.mxu3 %v1619_v8  ;;  %960 = vmatpush.bf16.msrb.mxu2 %v1671_v33 }
 0x35e   :  { %974 = vmatpush.bf16.msrb.mxu3 %v1625_v10  ;;  %961 = vmatpush.bf16.msrb.mxu2 %v1680_v40 }
 0x3d4   :  { %v611_v37 = vpop.f32.mrf.mxu2  ;;  %v624_v38 = vpop.f32.mrf.mxu3 }
 0x3d5   :  { %v612_v41 = vadd.f32 %v611_v37, %v1594_v57  ;;  %v625_v42 = vadd.f32 %v624_v38, %v374_v34 }
 0x3d7   :  { %1318 = vtanh.f32 %v625_v42  ;;  %v1253_v48 = vmul.f32 -1.442695, %v612_v41  ;;  %v1254_v7 = vmul.f32 -1.442695, %v625_v42 }
 0x3d9   :  { %1320 = vpow2.f32 %v1253_v48 }
 0x3dc   :  { %v613_v43 = vpop.f32.mrf.mxu2  ;;  %v626_v44 = vpop.f32.mrf.mxu3 }
 0x3dd   :  { %v1319_v46 = vpop.eup %1318 }
 0x3de   :  { %669 = vrot.lane.b32.xlu0 %v1319_v46, %s1421_s21 }
 0x3df   :  { %v1321_v49 = vpop.eup %1320 }
 0x3e0   :  { %v631_v45 = vadd.f32 1.0, %v1321_v49 }
 0x3e2   :  { %1322 = vrcp.f32 %v631_v45  ;;  %v643_v55 = vand.u32 2147483648, %v631_v45  ;;  %vm637_vm2 = vweird.f32 %v631_v45  ;;  %v641_v57 = vand.u32 2147483647, %v631_v45 }
 0x3e4   :  { %v644_v60 = vor.u32 1.1754944e-38, %v643_v55  ;;  %vm642_vm4 = vcmp.eq.f32.partialorder %v641_v57, 8.507059e+37 }
 0x3e8   :  { %v1323_v50 = vpop.eup %1322 }
 0x3e9   :  { %v633_v56 = vmul.f32 %v1323_v50, %v631_v45  ;;  %vm638_vm1 = vweird.f32 %v1323_v50 }
 0x3ea   :  { %vm639_vm3 = vmor %vm637_vm2, %vm638_vm1 }
 0x3eb   :  { %v634_v52 = vsub.f32 1.0, %v633_v56 }
 0x3ed   :  { %v635_v62 = vmul.f32 %v1323_v50, %v634_v52 }
 0x3ef   :  { %v636_v54 = vadd.f32 %v1323_v50, %v635_v62 }
 0x3f1   :  { %v640_v59 = vsel %vm639_vm3, %v1323_v50, %v636_v54 }
 0x3f2   :  { %v645_v63 = vsel %vm642_vm4, %v644_v60, %v640_v59 }
 0x3f3   :  { %v667_v2 = vmul.f32 %v645_v63, %v1731_v58 }
 0x450   :  { %v670_v61 = vpop.permute.xlu0 %669 }
 0x451   :  { %v672_v1 = vmul.f32 %v670_v61, %v645_v63 }
 0x453   :  { %674 = vrot.lane.b32.xlu1 %v672_v1, %s1421_s21 }
 0x4c5   :  { %v675_v3 = vpop.permute.xlu1 %674 }
 0x4c6   :  { %v1768_v5 = vadd.f32 %v675_v3, %v667_v2 }
 0x4c8   :  { %1324 = vtanh.f32 %v1768_v5 }
 0x4c9   :  { %1326 = vpow2.f32 %v1254_v7 }
 0x4ce   :  { %v1325_v6 = vpop.eup %1324 }
 0x4cf   :  { %680 = vrot.lane.b32.xlu2 %v1325_v6, %s1421_s21  ;;  %v1327_v9 = vpop.eup %1326 }
 0x4d0   :  { %v650_v15 = vadd.f32 1.0, %v1327_v9 }
 0x4d2   :  { %1328 = vrcp.f32 %v650_v15  ;;  %v662_v58 = vand.u32 2147483648, %v650_v15  ;;  %vm656_vm6 = vweird.f32 %v650_v15  ;;  %v660_v53 = vand.u32 2147483647, %v650_v15 }
 0x4d4   :  { %v663_v37 = vor.u32 1.1754944e-38, %v662_v58  ;;  %vm661_vm9 = vcmp.eq.f32.partialorder %v660_v53, 8.507059e+37 }
 0x4d8   :  { %v1329_v16 = vpop.eup %1328 }
 0x4d9   :  { %v652_v19 = vmul.f32 %v1329_v16, %v650_v15  ;;  %vm657_vm5 = vweird.f32 %v1329_v16 }
 0x4da   :  { %vm658_vm8 = vmor %vm656_vm6, %vm657_vm5 }
 0x4db   :  { %v653_v20 = vsub.f32 1.0, %v652_v19 }
 0x4dd   :  { %v654_v21 = vmul.f32 %v1329_v16, %v653_v20 }
 0x4df   :  { %v655_v22 = vadd.f32 %v1329_v16, %v654_v21 }
 0x4e1   :  { %v659_v34 = vsel %vm658_vm8, %v1329_v16, %v655_v22 }
 0x4e2   :  { %v664_v38 = vsel %vm661_vm9, %v663_v37, %v659_v34  ;;  %v339_v37 = vadd.f32 %v1747_v26, %v1552_v35 }
 0x529   :  { %v681_v41 = vpop.permute.xlu2 %680 }
 0x52a   :  { %v683_v42 = vmul.f32 %v681_v41, %v664_v38  ;;  %v380_v38 = vadd.f32 %v1745_v23, %v339_v37 }
 0x52c   :  { %v684_v43 = vpack.c.bf16 %v683_v42, %v683_v42 }
 0x52e   :  { %1255 = vmatmul.msk.bf16.vlgmr.msra.gmra.mxu0 %vm506_vm7, %v684_v43  ;;  %1256 = vmatmul.msk.bf16.vlgmr.msra.gmra.mxu1 %vm506_vm7, %v684_v43 }
 0x52f   :  { %1059 = vmatpush.bf16.msra.mxu1 %v1570_v47  ;;  %1046 = vmatpush.bf16.msra.mxu0 %v1651_v24 }
 0x533   :  { %1060 = vmatpush.bf16.msra.mxu1 %v1583_v51  ;;  %1047 = vmatpush.bf16.msra.mxu0 %v1661_v29 }
 0x537   :  { %1061 = vmatpush.bf16.msra.mxu1 %v1619_v8  ;;  %1048 = vmatpush.bf16.msra.mxu0 %v1671_v33 }
 0x53b   :  { %1062 = vmatpush.bf16.msra.mxu1 %v1625_v10  ;;  %1049 = vmatpush.bf16.msra.mxu0 %v1680_v40 }
 0x5ab   :  { %v699_v44 = vpop.f32.mrf.mxu0  ;;  %v712_v46 = vpop.f32.mrf.mxu1 }
 0x5ac   :  { %v700_v48 = vadd.f32 %v699_v44, %v1605_v0  ;;  %v713_v47 = vadd.f32 %v712_v46, %v1608_v4 }
 0x5ae   :  { %1330 = vtanh.f32 %v713_v47  ;;  %v1257_v29 = vmul.f32 -1.442695, %v700_v48  ;;  %v1258_v1 = vmul.f32 -1.442695, %v713_v47  ;;  %v257_v47 = vadd.f32 %v1714_v17, %v1554_v36 }
 0x5b0   :  { %1332 = vpow2.f32 %v1257_v29 }
 0x5b3   :  { %v701_v24 = vpop.f32.mrf.mxu0  ;;  %v714_v49 = vpop.f32.mrf.mxu1 }
 0x5b4   :  { %v1331_v51 = vpop.eup %1330  ;;  %v298_v24 = vadd.f32 %v1710_v14, %v257_v47 }
 0x5b5   :  { %757 = vrot.lane.b32.xlu0 %v1331_v51, %s1421_s21 }
 0x5b6   :  { %v1333_v8 = vpop.eup %1332 }
 0x5b7   :  { %v719_v33 = vadd.f32 1.0, %v1333_v8 }
 0x5b9   :  { %1334 = vrcp.f32 %v719_v33  ;;  %v731_v0 = vand.u32 2147483648, %v719_v33  ;;  %vm725_vm11 = vweird.f32 %v719_v33  ;;  %v729_v4 = vand.u32 2147483647, %v719_v33 }
 0x5bb   :  { %v732_v62 = vor.u32 1.1754944e-38, %v731_v0  ;;  %vm730_vm13 = vcmp.eq.f32.partialorder %v729_v4, 8.507059e+37 }
 0x5bf   :  { %v1335_v10 = vpop.eup %1334 }
 0x5c0   :  { %v721_v45 = vmul.f32 %v1335_v10, %v719_v33  ;;  %vm726_vm10 = vweird.f32 %v1335_v10 }
 0x5c1   :  { %vm727_vm12 = vmor %vm725_vm11, %vm726_vm10 }
 0x5c2   :  { %v722_v40 = vsub.f32 1.0, %v721_v45 }
 0x5c4   :  { %v723_v50 = vmul.f32 %v1335_v10, %v722_v40 }
 0x5c6   :  { %v724_v56 = vadd.f32 %v1335_v10, %v723_v50 }
 0x5c8   :  { %v728_v52 = vsel %vm727_vm12, %v1335_v10, %v724_v56 }
 0x5c9   :  { %v733_v55 = vsel %vm730_vm13, %v732_v62, %v728_v52 }
 0x5ca   :  { %v755_v59 = vmul.f32 %v733_v55, %v1768_v5 }
 0x627   :  { %v758_v54 = vpop.permute.xlu0 %757 }
 0x628   :  { %v760_v57 = vmul.f32 %v758_v54, %v733_v55 }
 0x62a   :  { %762 = vrot.lane.b32.xlu1 %v760_v57, %s1421_s21 }
 0x69c   :  { %v763_v60 = vpop.permute.xlu1 %762 }
 0x69d   :  { %v1787_v61 = vadd.f32 %v763_v60, %v755_v59 }
 0x69f   :  { %1336 = vtanh.f32 %v1787_v61 }
 0x6a0   :  { %1338 = vpow2.f32 %v1258_v1 }
 0x6a5   :  { %v1337_v63 = vpop.eup %1336 }
 0x6a6   :  { %768 = vrot.lane.b32.xlu2 %v1337_v63, %s1421_s21  ;;  %v1339_v2 = vpop.eup %1338 }
 0x6a7   :  { %v738_v3 = vadd.f32 1.0, %v1339_v2 }
 0x6a9   :  { %1340 = vrcp.f32 %v738_v3  ;;  %v750_v5 = vand.u32 2147483648, %v738_v3  ;;  %vm744_vm15 = vweird.f32 %v738_v3  ;;  %v748_v19 = vand.u32 2147483647, %v738_v3 }
 0x6ab   :  { %v751_v21 = vor.u32 1.1754944e-38, %v750_v5  ;;  %vm749_vm1 = vcmp.eq.f32.partialorder %v748_v19, 8.507059e+37 }
 0x6af   :  { %v1341_v6 = vpop.eup %1340 }
 0x6b0   :  { %v740_v7 = vmul.f32 %v1341_v6, %v738_v3  ;;  %vm745_vm14 = vweird.f32 %v1341_v6 }
 0x6b1   :  { %vm746_vm0 = vmor %vm744_vm15, %vm745_vm14 }
 0x6b2   :  { %v741_v9 = vsub.f32 1.0, %v740_v7 }
 0x6b4   :  { %v742_v15 = vmul.f32 %v1341_v6, %v741_v9 }
 0x6b6   :  { %v743_v16 = vadd.f32 %v1341_v6, %v742_v15 }
 0x6b8   :  { %v747_v20 = vsel %vm746_vm0, %v1341_v6, %v743_v16 }
 0x6b9   :  { %v752_v22 = vsel %vm749_vm1, %v751_v21, %v747_v20  ;;  %v260_v21 = vadd.f32 %v1718_v13, %v1554_v36 }
 0x700   :  { %v769_v58 = vpop.permute.xlu2 %768 }
 0x701   :  { %v771_v53 = vmul.f32 %v769_v58, %v752_v22  ;;  %v342_v22 = vadd.f32 %v1751_v28, %v1552_v35  ;;  %v301_v58 = vadd.f32 %v1712_v11, %v260_v21 }
 0x703   :  { %v772_v34 = vpack.c.bf16 %v771_v53, %v771_v53  ;;  %v383_v53 = vadd.f32 %v1749_v27, %v342_v22 }
 0x705   :  { %1259 = vmatmul.msk.bf16.vlgmr.msra.gmra.mxu2 %vm506_vm7, %v772_v34  ;;  %1260 = vmatmul.msk.bf16.vlgmr.msra.gmra.mxu3 %vm506_vm7, %v772_v34 }
 0x788   :  { %v787_v41 = vpop.f32.mrf.mxu2  ;;  %v800_v42 = vpop.f32.mrf.mxu3 }
 0x789   :  { %v801_v43 = vadd.f32 %v800_v42, %v380_v38  ;;  %v788_v49 = vadd.f32 %v787_v41, %v298_v24 }
 0x78b   :  { %1342 = vtanh.f32 %v801_v43  ;;  %v1261_v51 = vmul.f32 -1.442695, %v788_v49  ;;  %v1262_v57 = vmul.f32 -1.442695, %v801_v43 }
 0x78d   :  { %1344 = vpow2.f32 %v1261_v51 }
 0x790   :  { %v789_v44 = vpop.f32.mrf.mxu2  ;;  %v802_v46 = vpop.f32.mrf.mxu3 }
 0x791   :  { %v1343_v48 = vpop.eup %1342 }
 0x792   :  { %845 = vrot.lane.b32.xlu0 %v1343_v48, %s1421_s21 }
 0x793   :  { %v1345_v26 = vpop.eup %1344 }
 0x794   :  { %v807_v29 = vadd.f32 1.0, %v1345_v26 }
 0x796   :  { %1346 = vrcp.f32 %v807_v29  ;;  %v819_v40 = vand.u32 2147483648, %v807_v29  ;;  %vm813_vm3 = vweird.f32 %v807_v29  ;;  %v817_v50 = vand.u32 2147483647, %v807_v29 }
 0x798   :  { %v820_v17 = vor.u32 1.1754944e-38, %v819_v40  ;;  %vm818_vm5 = vcmp.eq.f32.partialorder %v817_v50, 8.507059e+37 }
 0x79c   :  { %v1347_v23 = vpop.eup %1346 }
 0x79d   :  { %v809_v8 = vmul.f32 %v1347_v23, %v807_v29  ;;  %vm814_vm2 = vweird.f32 %v1347_v23 }
 0x79e   :  { %vm815_vm4 = vmor %vm813_vm3, %vm814_vm2 }
 0x79f   :  { %v810_v33 = vsub.f32 1.0, %v809_v8 }
 0x7a1   :  { %v811_v10 = vmul.f32 %v1347_v23, %v810_v33 }
 0x7a3   :  { %v812_v45 = vadd.f32 %v1347_v23, %v811_v10 }
 0x7a5   :  { %v816_v56 = vsel %vm815_vm4, %v1347_v23, %v812_v45 }
 0x7a6   :  { %v821_v0 = vsel %vm818_vm5, %v820_v17, %v816_v56 }
 0x7a7   :  { %v843_v52 = vmul.f32 %v821_v0, %v1787_v61 }
 0x804   :  { %v846_v14 = vpop.permute.xlu0 %845 }
 0x805   :  { %v848_v4 = vmul.f32 %v846_v14, %v821_v0 }
 0x807   :  { %850 = vrot.lane.b32.xlu1 %v848_v4, %s1421_s21 }
 0x879   :  { %v851_v62 = vpop.permute.xlu1 %850 }
 0x87a   :  { %v1802_v54 = vadd.f32 %v851_v62, %v843_v52 }
 0x87c   :  { %1348 = vtanh.f32 %v1802_v54 }
 0x87d   :  { %1350 = vpow2.f32 %v1262_v57 }
 0x882   :  { %v1349_v55 = vpop.eup %1348 }
 0x883   :  { %856 = vrot.lane.b32.xlu2 %v1349_v55, %s1421_s21  ;;  %v1351_v59 = vpop.eup %1350 }
 0x884   :  { %v826_v60 = vadd.f32 1.0, %v1351_v59 }
 0x886   :  { %1352 = vrcp.f32 %v826_v60  ;;  %v838_v61 = vand.u32 2147483648, %v826_v60  ;;  %vm832_vm8 = vweird.f32 %v826_v60  ;;  %v836_v7 = vand.u32 2147483647, %v826_v60 }
 0x888   :  { %v839_v15 = vor.u32 1.1754944e-38, %v838_v61  ;;  %vm837_vm10 = vcmp.eq.f32.partialorder %v836_v7, 8.507059e+37  ;;  %v345_v61 = vadd.f32 %v1755_v39, %v1552_v35 }
 0x88c   :  { %v1353_v63 = vpop.eup %1352 }
 0x88d   :  { %v828_v1 = vmul.f32 %v1353_v63, %v826_v60  ;;  %vm833_vm6 = vweird.f32 %v1353_v63 }
 0x88e   :  { %vm834_vm9 = vmor %vm832_vm8, %vm833_vm6 }
 0x88f   :  { %v829_v2 = vsub.f32 1.0, %v828_v1 }
 0x891   :  { %v830_v3 = vmul.f32 %v1353_v63, %v829_v2 }
 0x893   :  { %v831_v6 = vadd.f32 %v1353_v63, %v830_v3 }
 0x895   :  { %v835_v9 = vsel %vm834_vm9, %v1353_v63, %v831_v6  ;;  %v263_v6 = vadd.f32 %v1722_v18, %v1554_v36 }
 0x896   :  { %v840_v16 = vsel %vm837_vm10, %v839_v15, %v835_v9  ;;  %v386_v9 = vadd.f32 %v1753_v30, %v345_v61 }
 0x897   :  { %v304_v7 = vadd.f32 %v1716_v12, %v263_v6 }
 0x8dd   :  { %v857_v5 = vpop.permute.xlu2 %856 }
 0x8de   :  { %v859_v19 = vmul.f32 %v857_v5, %v840_v16 }
 0x8e0   :  { %v860_v20 = vpack.c.bf16 %v859_v19, %v859_v19 }
 0x8e2   :  { %1263 = vmatmul.msk.bf16.vlgmr.msrb.gmra.mxu0 %vm506_vm7, %v860_v20  ;;  %1264 = vmatmul.msk.bf16.vlgmr.msrb.gmra.mxu1 %vm506_vm7, %v860_v20 }
 0x95f   :  { %v875_v34 = vpop.f32.mrf.mxu0  ;;  %v888_v37 = vpop.f32.mrf.mxu1 }
 0x960   :  { %v876_v38 = vadd.f32 %v875_v34, %v301_v58  ;;  %v889_v41 = vadd.f32 %v888_v37, %v383_v53 }
 0x962   :  { %1354 = vtanh.f32 %v889_v41  ;;  %v1265_v46 = vmul.f32 -1.442695, %v876_v38  ;;  %v1266_v56 = vmul.f32 -1.442695, %v889_v41 }
 0x964   :  { %1356 = vpow2.f32 %v1265_v46 }
 0x967   :  { %v877_v42 = vpop.f32.mrf.mxu0  ;;  %v890_v43 = vpop.f32.mrf.mxu1 }
 0x968   :  { %v1355_v44 = vpop.eup %1354 }
 0x969   :  { %933 = vrot.lane.b32.xlu0 %v1355_v44, %s1421_s21 }
 0x96a   :  { %v1357_v13 = vpop.eup %1356 }
 0x96b   :  { %v895_v48 = vadd.f32 1.0, %v1357_v13 }
 0x96d   :  { %1358 = vrcp.f32 %v895_v48  ;;  %v907_v49 = vand.u32 2147483648, %v895_v48  ;;  %vm901_vm12 = vweird.f32 %v895_v48  ;;  %v905_v51 = vand.u32 2147483647, %v895_v48 }
 0x96f   :  { %v908_v29 = vor.u32 1.1754944e-38, %v907_v49  ;;  %vm906_vm14 = vcmp.eq.f32.partialorder %v905_v51, 8.507059e+37 }
 0x973   :  { %v1359_v28 = vpop.eup %1358 }
 0x974   :  { %v897_v47 = vmul.f32 %v1359_v28, %v895_v48  ;;  %vm902_vm11 = vweird.f32 %v1359_v28 }
 0x975   :  { %vm903_vm13 = vmor %vm901_vm12, %vm902_vm11 }
 0x976   :  { %v898_v11 = vsub.f32 1.0, %v897_v47 }
 0x978   :  { %v899_v24 = vmul.f32 %v1359_v28, %v898_v11 }
 0x97a   :  { %v900_v27 = vadd.f32 %v1359_v28, %v899_v24 }
 0x97c   :  { %v904_v26 = vsel %vm903_vm13, %v1359_v28, %v900_v27 }
 0x97d   :  { %v909_v8 = vsel %vm906_vm14, %v908_v29, %v904_v26 }
 0x97e   :  { %v931_v10 = vmul.f32 %v909_v8, %v1802_v54 }
 0x9db   :  { %v934_v23 = vpop.permute.xlu0 %933 }
 0x9dc   :  { %v936_v33 = vmul.f32 %v934_v23, %v909_v8 }
 0x9de   :  { %938 = vrot.lane.b32.xlu1 %v936_v33, %s1421_s21 }
 0xa50   :  { %v939_v45 = vpop.permute.xlu1 %938 }
 0xa51   :  { %v1817_v40 = vadd.f32 %v939_v45, %v931_v10 }
 0xa53   :  { %1360 = vtanh.f32 %v1817_v40 }
 0xa54   :  { %1362 = vpow2.f32 %v1266_v56 }
 0xa59   :  { %v1361_v50 = vpop.eup %1360 }
 0xa5a   :  { %944 = vrot.lane.b32.xlu2 %v1361_v50, %s1421_s21  ;;  %v1363_v17 = vpop.eup %1362 }
 0xa5b   :  { %v914_v14 = vadd.f32 1.0, %v1363_v17 }
 0xa5d   :  { %1364 = vrcp.f32 %v914_v14  ;;  %v926_v54 = vand.u32 2147483648, %v914_v14  ;;  %vm920_vm0 = vweird.f32 %v914_v14  ;;  %v924_v57 = vand.u32 2147483647, %v914_v14 }
 0xa5f   :  { %v927_v60 = vor.u32 1.1754944e-38, %v926_v54  ;;  %vm925_vm2 = vcmp.eq.f32.partialorder %v924_v57, 8.507059e+37 }
 0xa63   :  { %v1365_v0 = vpop.eup %1364 }
 0xa64   :  { %v916_v4 = vmul.f32 %v1365_v0, %v914_v14  ;;  %vm921_vm15 = vweird.f32 %v1365_v0  ;;  %v348_v14 = vadd.f32 %v1759_v32, %v1552_v35 }
 0xa65   :  { %vm922_vm1 = vmor %vm920_vm0, %vm921_vm15 }
 0xa66   :  { %v917_v52 = vsub.f32 1.0, %v916_v4 }
 0xa68   :  { %v918_v62 = vmul.f32 %v1365_v0, %v917_v52 }
 0xa6a   :  { %v919_v55 = vadd.f32 %v1365_v0, %v918_v62 }
 0xa6c   :  { %v923_v59 = vsel %vm922_vm1, %v1365_v0, %v919_v55  ;;  %v389_v0 = vadd.f32 %v1757_v31, %v348_v14 }
 0xa6d   :  { %v928_v63 = vsel %vm925_vm2, %v927_v60, %v923_v59 }
 0xab4   :  { %v945_v1 = vpop.permute.xlu2 %944 }
 0xab5   :  { %v947_v2 = vmul.f32 %v945_v1, %v928_v63 }
 0xab7   :  { %v948_v3 = vpack.c.bf16 %v947_v2, %v947_v2 }
 0xab9   :  { %1267 = vmatmul.msk.bf16.vlgmr.msrb.gmra.mxu2 %vm506_vm7, %v948_v3  ;;  %1268 = vmatmul.msk.bf16.vlgmr.msrb.gmra.mxu3 %vm506_vm7, %v948_v3 }
 0xb3c   :  { %v963_v15 = vpop.f32.mrf.mxu2  ;;  %v976_v16 = vpop.f32.mrf.mxu3 }
 0xb3d   :  { %v964_v5 = vadd.f32 %v963_v15, %v304_v7  ;;  %v977_v19 = vadd.f32 %v976_v16, %v386_v9 }
 0xb3f   :  { %1366 = vtanh.f32 %v977_v19  ;;  %v1269_v58 = vmul.f32 -1.442695, %v964_v5  ;;  %v1270_v11 = vmul.f32 -1.442695, %v977_v19  ;;  %v1131_v5 = vld [vmem:[%s1882_s5 + $0x38] sm:$0xff]  ;;  %v1130_v19 = vld [vmem:[%s1882_s5 + $0x30] sm:$0xff] }
 0xb40   :  { %1147 = vmatpush.msra.mxu2 %v1131_v5 }
 0xb41   :  { %1368 = vpow2.f32 %v1269_v58  ;;  %v1126_v58 = vld [vmem:[%s1882_s5 + $0x10] sm:$0xff] }
 0xb42   :  { %1148 = vmatpush.msra.mxu2 %v1130_v19 }
 0xb44   :  { %v965_v20 = vpop.f32.mrf.mxu2  ;;  %v978_v21 = vpop.f32.mrf.mxu3 }
 0xb45   :  { %v1367_v22 = vpop.eup %1366  ;;  %v1129_v20 = vld [vmem:[%s1882_s5 + $0x28] sm:$0xff]  ;;  %v1128_v21 = vld [vmem:[%s1882_s5 + $0x20] sm:$0xff] }
 0xb46   :  { %1021 = vrot.lane.b32.xlu0 %v1367_v22, %s1421_s21  ;;  %1149 = vmatpush.msra.mxu2 %v1129_v20  ;;  %v1127_v22 = vld [vmem:[%s1882_s5 + $0x18] sm:$0xff] }
 0xb47   :  { %v1369_v36 = vpop.eup %1368 }
 0xb48   :  { %v983_v18 = vadd.f32 1.0, %v1369_v36  ;;  %1150 = vmatpush.msra.mxu2 %v1128_v21  ;;  %v1125_v36 = vld [vmem:[%s1882_s5 + $0x8] sm:$0xff] }
 0xb4a   :  { %1370 = vrcp.f32 %v983_v18  ;;  %v995_v37 = vand.u32 2147483648, %v983_v18  ;;  %vm989_vm4 = vweird.f32 %v983_v18  ;;  %v993_v38 = vand.u32 2147483647, %v983_v18  ;;  %1151 = vmatpush.msra.mxu2 %v1127_v22 }
 0xb4c   :  { %v996_v42 = vor.u32 1.1754944e-38, %v995_v37  ;;  %vm994_vm6 = vcmp.eq.f32.partialorder %v993_v38, 8.507059e+37  ;;  %1152 = vmatpush.msra.mxu2 %v1126_v58  ;;  %v1124_v38 = vld [vmem:[%s1882_s5] sm:$0xff] }
 0xb4e   :  { %1153 = vmatpush.msra.mxu2 %v1125_v36 }
 0xb50   :  { %v1371_v39 = vpop.eup %1370  ;;  %1154 = vmatpush.msra.mxu2 %v1124_v38 }
 0xb51   :  { %v985_v53 = vmul.f32 %v1371_v39, %v983_v18  ;;  %vm990_vm3 = vweird.f32 %v1371_v39 }
 0xb52   :  { %vm991_vm5 = vmor %vm989_vm4, %vm990_vm3 }
 0xb53   :  { %v986_v12 = vsub.f32 1.0, %v985_v53 }
 0xb55   :  { %v987_v34 = vmul.f32 %v1371_v39, %v986_v12 }
 0xb57   :  { %v988_v30 = vadd.f32 %v1371_v39, %v987_v34 }
 0xb59   :  { %v992_v41 = vsel %vm991_vm5, %v1371_v39, %v988_v30 }
 0xb5a   :  { %v997_v44 = vsel %vm994_vm6, %v996_v42, %v992_v41 }
 0xb5b   :  { %v1019_v13 = vmul.f32 %v997_v44, %v1817_v40 }
 0xbb8   :  { %v1022_v43 = vpop.permute.xlu0 %1021 }
 0xbb9   :  { %v1024_v46 = vmul.f32 %v1022_v43, %v997_v44 }
 0xbbb   :  { %1026 = vrot.lane.b32.xlu1 %v1024_v46, %s1421_s21 }
 0xc2d   :  { %v1027_v48 = vpop.permute.xlu1 %1026 }
 0xc2e   :  { %v1832_v28 = vadd.f32 %v1027_v48, %v1019_v13 }
 0xc30   :  { %1372 = vtanh.f32 %v1832_v28 }
 0xc31   :  { %1374 = vpow2.f32 %v1270_v11 }
 0xc36   :  { %v1373_v47 = vpop.eup %1372 }
 0xc37   :  { %1032 = vrot.lane.b32.xlu2 %v1373_v47, %s1421_s21  ;;  %v1375_v24 = vpop.eup %1374 }
 0xc38   :  { %v1002_v27 = vadd.f32 1.0, %v1375_v24 }
 0xc3a   :  { %1376 = vrcp.f32 %v1002_v27  ;;  %v1014_v8 = vand.u32 2147483648, %v1002_v27  ;;  %vm1008_vm9 = vweird.f32 %v1002_v27  ;;  %v1012_v33 = vand.u32 2147483647, %v1002_v27 }
 0xc3c   :  { %v1015_v45 = vor.u32 1.1754944e-38, %v1014_v8  ;;  %vm1013_vm11 = vcmp.eq.f32.partialorder %v1012_v33, 8.507059e+37 }
 0xc40   :  { %v1377_v49 = vpop.eup %1376 }
 0xc41   :  { %v1004_v51 = vmul.f32 %v1377_v49, %v1002_v27  ;;  %vm1009_vm8 = vweird.f32 %v1377_v49 }
 0xc42   :  { %vm1010_vm10 = vmor %vm1008_vm9, %vm1009_vm8 }
 0xc43   :  { %v1005_v26 = vsub.f32 1.0, %v1004_v51 }
 0xc45   :  { %v1006_v29 = vmul.f32 %v1377_v49, %v1005_v26 }
 0xc47   :  { %v1007_v23 = vadd.f32 %v1377_v49, %v1006_v29 }
 0xc49   :  { %v1011_v10 = vsel %vm1010_vm10, %v1377_v49, %v1007_v23  ;;  %v1293_v49 = vld [vmem:[%s1883_s6] ss:$0 sm:$0xff] }
 0xc4a   :  { %v1016_v40 = vsel %vm1013_vm11, %v1015_v45, %v1011_v10 }
 0xc91   :  { %v1033_v50 = vpop.permute.xlu2 %1032 }
 0xc92   :  { %v1035_v56 = vmul.f32 %v1033_v50, %v1016_v40 }
 0xc94   :  { %v1036_v17 = vpack.c.bf16 %v1035_v56, %v1035_v56 }
 0xc96   :  { %1271 = vmatmul.msk.bf16.vlgmr.msra.gmra.mxu0 %vm506_vm7, %v1036_v17  ;;  %1272 = vmatmul.msk.bf16.vlgmr.msra.gmra.mxu1 %vm506_vm7, %v1036_v17 }
 0xd13   :  { %v1051_v4 = vpop.f32.mrf.mxu0  ;;  %v1064_v52 = vpop.f32.mrf.mxu1 }
 0xd14   :  { %v1052_v62 = vadd.f32 %v1051_v4, %v1726_v25  ;;  %v1065_v55 = vadd.f32 %v1064_v52, %v389_v0 }
 0xd16   :  { %1378 = vtanh.f32 %v1065_v55  ;;  %v1273_v60 = vmul.f32 -1.442695, %v1052_v62  ;;  %v1274_v34 = vmul.f32 -1.442695, %v1065_v55 }
 0xd18   :  { %1380 = vpow2.f32 %v1273_v60 }
 0xd1b   :  { %v1053_v54 = vpop.f32.mrf.mxu0  ;;  %v1066_v57 = vpop.f32.mrf.mxu1 }
 0xd1c   :  { %v1379_v59 = vpop.eup %1378 }
 0xd1d   :  { %1109 = vrot.lane.b32.xlu0 %v1379_v59, %s1421_s21 }
 0xd1e   :  { %v1381_v63 = vpop.eup %1380 }
 0xd1f   :  { %v1071_v1 = vadd.f32 1.0, %v1381_v63 }
 0xd21   :  { %1382 = vrcp.f32 %v1071_v1  ;;  %v1083_v6 = vand.u32 2147483648, %v1071_v1  ;;  %vm1077_vm13 = vweird.f32 %v1071_v1  ;;  %v1081_v25 = vand.u32 2147483647, %v1071_v1 }
 0xd23   :  { %v1084_v7 = vor.u32 1.1754944e-38, %v1083_v6  ;;  %vm1082_vm15 = vcmp.eq.f32.partialorder %v1081_v25, 8.507059e+37 }
 0xd27   :  { %v1383_v2 = vpop.eup %1382 }
 0xd28   :  { %v1073_v35 = vmul.f32 %v1383_v2, %v1071_v1  ;;  %vm1078_vm12 = vweird.f32 %v1383_v2 }
 0xd29   :  { %vm1079_vm14 = vmor %vm1077_vm13, %vm1078_vm12 }
 0xd2a   :  { %v1074_v32 = vsub.f32 1.0, %v1073_v35 }
 0xd2c   :  { %v1075_v31 = vmul.f32 %v1383_v2, %v1074_v32 }
 0xd2e   :  { %v1076_v3 = vadd.f32 %v1383_v2, %v1075_v31 }
 0xd30   :  { %v1080_v61 = vsel %vm1079_vm14, %v1383_v2, %v1076_v3 }
 0xd31   :  { %v1085_v15 = vsel %vm1082_vm15, %v1084_v7, %v1080_v61 }
 0xd32   :  { %v1107_v18 = vmul.f32 %v1085_v15, %v1832_v28 }
 0xd8f   :  { %v1110_v9 = vpop.permute.xlu0 %1109 }
 0xd90   :  { %v1112_v16 = vmul.f32 %v1110_v9, %v1085_v15 }
 0xd92   :  { %1114 = vrot.lane.b32.xlu1 %v1112_v16, %s1421_s21 }
 0xe04   :  { %v1115_v39 = vpop.permute.xlu1 %1114 }
 0xe05   :  { %v1117_v53 = vadd.f32 %v1115_v39, %v1107_v18 }
 0xe07   :  { %1384 = vtanh.f32 %v1117_v53 }
 0xe08   :  { %1386 = vpow2.f32 %v1274_v34 }
 0xe0d   :  { %v1385_v12 = vpop.eup %1384 }
 0xe0e   :  { %1120 = vrot.lane.b32.xlu2 %v1385_v12, %s1421_s21  ;;  %v1387_v30 = vpop.eup %1386 }
 0xe0f   :  { %v1090_v37 = vadd.f32 1.0, %v1387_v30 }
 0xe11   :  { %1388 = vrcp.f32 %v1090_v37  ;;  %v1102_v13 = vand.u32 2147483648, %v1090_v37  ;;  %vm1096_vm1 = vweird.f32 %v1090_v37  ;;  %v1100_v48 = vand.u32 2147483647, %v1090_v37 }
 0xe13   :  { %v1103_v47 = vor.u32 1.1754944e-38, %v1102_v13  ;;  %vm1101_vm3 = vcmp.eq.f32.partialorder %v1100_v48, 8.507059e+37 }
 0xe17   :  { %v1389_v41 = vpop.eup %1388 }
 0xe18   :  { %v1092_v42 = vmul.f32 %v1389_v41, %v1090_v37  ;;  %vm1097_vm0 = vweird.f32 %v1389_v41 }
 0xe19   :  { %vm1098_vm2 = vmor %vm1096_vm1, %vm1097_vm0 }
 0xe1a   :  { %v1093_v43 = vsub.f32 1.0, %v1092_v42 }
 0xe1c   :  { %v1094_v44 = vmul.f32 %v1389_v41, %v1093_v43 }
 0xe1e   :  { %v1095_v46 = vadd.f32 %v1389_v41, %v1094_v44 }
 0xe20   :  { %v1099_v28 = vsel %vm1098_vm2, %v1389_v41, %v1095_v46 }
 0xe21   :  { %v1104_v11 = vsel %vm1101_vm3, %v1103_v47, %v1099_v28 }
 0xe68   :  { %v1121_v24 = vpop.permute.xlu2 %1120 }
 0xe69   :  { %v1123_v27 = vmul.f32 %v1121_v24, %v1104_v11 }
 0xe6b   :  { %1275 = vmatmul.msk.f32.vlgmr.msra.gmra.mxu2 %vm506_vm7, %v1123_v27 }
 0xeee   :  { %v1156_v51 = vpop.f32.mrf.mxu2 }
 0xeef   :  { %v1157_v26 = vadd.f32 %v1293_v49, %v1156_v51 }
 0xef1   :  { %1159 = vst [vmem:[%s1884_s7] sm:$0xff] %v1157_v26 }
 0xef2   :  { %1164 = vsyncpa [#allocation4], 1 }

</bundles_post_ra>
